<compile_context>
chip_gen: v7x
topology: tpu7x:2x2x1
jax: 0.10.0
libtpu: 0.0.40
codegen_flags: <defaults>
</compile_context>

<pallas_src>
import functools

import jax
import jax.numpy as jnp
from jax.experimental import pallas as pl
from jax.experimental.pallas import tpu as pltpu

_LANE = 128


def _round_up(x, m):
    return (x + m - 1) // m * m


def _linmodel_kernel(patches_ref, pool_ref, wconv_ref, bconv_ref,
                     wlin_ref, blin_ref, out_ref):
    """One batch tile: fused-im2col conv matmul -> ReLU -> MXU pool -> head."""
    # Conv as a single MXU matmul: (b_tile*HW, KKC_pad) @ (KKC_pad, F_pad).
    feats = jnp.dot(patches_ref[...], wconv_ref[...],
                    preferred_element_type=jnp.float32)
    # Bias + ReLU in f32 (single elementwise pass).
    feats = jnp.maximum(feats + bconv_ref[...], 0.0)              # (b_tile*HW, F_pad)

    # Global average pool on the MXU: (b_tile, b_tile*HW) @ (b_tile*HW, F_pad).
    pooled = jnp.dot(pool_ref[...], feats,
                     preferred_element_type=jnp.float32)          # (b_tile, F_pad)

    # Linear head in f32 (tiny), lane-dense padded classes.
    logits = jnp.dot(pooled, wlin_ref[...],
                     preferred_element_type=jnp.float32) + blin_ref[...]
    out_ref[...] = logits.astype(out_ref.dtype)                   # (b_tile, NC_pad)


@functools.partial(jax.jit, static_argnames=("kernel_size", "padding"))
def lin_model_forward(x_nchw, w_conv, b_conv, w_lin, b_lin,
                      kernel_size=3, padding=1):
    """Forward pass of LinModel with the synthetic conv encoder.

    x_nchw : (N, C_in, H, W) float32      (PyTorch NCHW)
    w_conv : (F, C_in, k, k)              (PyTorch Conv2d weight layout)
    b_conv : (F,)
    w_lin  : (n_classes, F)               (PyTorch Linear weight layout)
    b_lin  : (n_classes,)
    returns: (N, n_classes) float32
    """
    n, c_in, h, w = x_nchw.shape
    f = w_conv.shape[0]
    n_classes = w_lin.shape[0]
    k = kernel_size
    hw = h * w
    kkc = k * k * c_in

    # Zero-pad feature / class / contraction dims to full 128-lane widths.
    # Padding is exact: padded contraction columns hit zero weight rows, padded
    # conv channels are 0 after ReLU and see zero head rows, padded class
    # columns are sliced off below.
    f_pad = _round_up(f, _LANE)
    nc_pad = _round_up(n_classes, _LANE)
    kkc_pad = _round_up(kkc, _LANE)

    # Small batch tile: minimal padding waste, ~1 MiB live per step, and
    # multiple "parallel" grid steps for megacore whenever N > b_tile.
    b_tile = 8
    n_pad = _round_up(n, b_tile)

    # ---- Wrapper-side im2col (lane-dense patches) -------------------------
    x_nhwc = jnp.transpose(x_nchw, (0, 2, 3, 1))                  # (N, H, W, C)
    xp = jnp.pad(x_nhwc, ((0, n_pad - n), (padding, padding),
                          (padding, padding), (0, 0)))
    taps = [xp[:, di:di + h, dj:dj + w, :]
            for di in range(k) for dj in range(k)]                # each (N, H, W, C)
    patches = jnp.concatenate(taps, axis=-1)                      # (N, H, W, k*k*C)
    patches = patches.reshape(n_pad * hw, kkc)
    patches = jnp.pad(patches, ((0, 0), (0, kkc_pad - kkc))).astype(jnp.bfloat16)

    # Conv weight (F, C, kh, kw) -> (kh*kw*C, F) matching patch column order
    # ((di*k + dj)*C + c), then pad and cast.
    wconv = jnp.transpose(w_conv, (2, 3, 1, 0)).reshape(kkc, f)
    wconv = jnp.pad(wconv, ((0, kkc_pad - kkc), (0, f_pad - f))).astype(jnp.bfloat16)
    bconv = jnp.pad(b_conv, (0, f_pad - f)).reshape(1, f_pad).astype(jnp.float32)

    # Pooling matrix: block-diagonal I_b ⊗ ones(1, HW) / HW  (resident, f32).
    pool = jnp.repeat(jnp.eye(b_tile, dtype=jnp.float32), hw, axis=1) / hw
    # shape (b_tile, b_tile*hw)

    # Linear head (n_classes, F) -> (F_pad, NC_pad) f32; bias (1, NC_pad) f32.
    wlin = jnp.pad(jnp.transpose(w_lin, (1, 0)),
                   ((0, f_pad - f), (0, nc_pad - n_classes))).astype(jnp.float32)
    blin = jnp.pad(b_lin, (0, nc_pad - n_classes)
                   ).reshape(1, nc_pad).astype(jnp.float32)

    grid_steps = n_pad // b_tile
    flops = grid_steps * (2 * b_tile * hw * kkc_pad * f_pad           # conv
                          + 2 * b_tile * (b_tile * hw) * f_pad        # pool
                          + 2 * b_tile * f_pad * nc_pad)              # head
    bytes_accessed = (patches.size * 2 + wconv.size * 2 + pool.size * 4
                      + bconv.size * 4 + wlin.size * 4 + blin.size * 4
                      + n_pad * nc_pad * 4)

    out = pl.pallas_call(
        _linmodel_kernel,
        out_shape=jax.ShapeDtypeStruct((n_pad, nc_pad), jnp.float32),
        grid_spec=pltpu.PrefetchScalarGridSpec(
            num_scalar_prefetch=0,
            grid=(grid_steps,),
            in_specs=[
                # Per-tile lane-dense im2col patches.
                pl.BlockSpec((b_tile * hw, kkc_pad), lambda b: (b, 0)),
                # Pooling matrix + weights/biases: full arrays, resident.
                pl.BlockSpec((b_tile, b_tile * hw), lambda b: (0, 0)),
                pl.BlockSpec((kkc_pad, f_pad), lambda b: (0, 0)),
                pl.BlockSpec((1, f_pad), lambda b: (0, 0)),
                pl.BlockSpec((f_pad, nc_pad), lambda b: (0, 0)),
                pl.BlockSpec((1, nc_pad), lambda b: (0, 0)),
            ],
            out_specs=pl.BlockSpec((b_tile, nc_pad), lambda b: (b, 0)),
        ),
        compiler_params=pltpu.CompilerParams(
            dimension_semantics=("parallel",),
            vmem_limit_bytes=32 * 1024 * 1024),
        cost_estimate=pl.CostEstimate(flops=flops, transcendentals=0,
                                      bytes_accessed=bytes_accessed),
    )(patches, pool, wconv, bconv, wlin, blin)

    # Slice off batch / class padding.
    return out[:n, :n_classes]


def init_params(key, c_in, feature_dim, n_classes, k=3):
    """Deterministic synthetic parameter init (roughly PyTorch-default scaled)."""
    k_conv_w, k_conv_b, k_lin_w, k_lin_b = jax.random.split(key, 4)
    fan_conv = c_in * k * k
    bound_c = 1.0 / jnp.sqrt(fan_conv)
    w_conv = jax.random.uniform(k_conv_w, (feature_dim, c_in, k, k),
                                jnp.float32, -bound_c, bound_c)
    b_conv = jax.random.uniform(k_conv_b, (feature_dim,),
                                jnp.float32, -bound_c, bound_c)
    bound_l = 1.0 / jnp.sqrt(feature_dim)
    w_lin = jax.random.uniform(k_lin_w, (n_classes, feature_dim),
                               jnp.float32, -bound_l, bound_l)
    b_lin = jax.random.uniform(k_lin_b, (n_classes,),
                               jnp.float32, -bound_l, bound_l)
    return w_conv, b_conv, w_lin, b_lin


if __name__ == "__main__":
    key = jax.random.PRNGKey(0)
    k_x, k_p = jax.random.split(key)

    # Small shapes consistent with LinModel: batch=2, channels=4, spatial=16,
    # feature_dim=32, n_classes=10.
    N, C_IN, H, W = 2, 4, 16, 16
    FEATURE_DIM, N_CLASSES = 32, 10

    x = jax.random.normal(k_x, (N, C_IN, H, W), jnp.float32)
    w_conv, b_conv, w_lin, b_lin = init_params(k_p, C_IN, FEATURE_DIM,
                                               N_CLASSES)

    logits = lin_model_forward(x, w_conv, b_conv, w_lin, b_lin)
    jax.block_until_ready(logits)

    assert logits.shape == (N, N_CLASSES), logits.shape
    assert logits.dtype == jnp.float32, logits.dtype
    print("KERNEL_OK")
</pallas_src>

<mosaic_0001>
module attributes {stable_mosaic.version = 11 : i64} {
  func.func @_linmodel_kernel(%arg0: i32, %arg1: memref<2048x128xbf16, #tpu.memory_space<vmem>>, %arg2: memref<8x2048xf32, #tpu.memory_space<vmem>>, %arg3: memref<128x128xbf16, #tpu.memory_space<vmem>>, %arg4: memref<1x128xf32, #tpu.memory_space<vmem>>, %arg5: memref<128x128xf32, #tpu.memory_space<vmem>>, %arg6: memref<1x128xf32, #tpu.memory_space<vmem>>, %arg7: memref<8x128xf32, #tpu.memory_space<vmem>>) attributes {dimension_semantics = [#tpu.dimension_semantics<parallel>], iteration_bounds = array<i64: 1>, scalar_prefetch = 0 : i64, scratch_operands = 0 : i64, tpu.core_type = #tpu.core_type<tc>, window_params = [{transform_indices = @transform_0, window_bounds = array<i64: 2048, 128>}, {pipeline_mode = #tpu.pipeline_mode<synchronous>, transform_indices = @transform_1, window_bounds = array<i64: 8, 2048>}, {pipeline_mode = #tpu.pipeline_mode<synchronous>, transform_indices = @transform_2, window_bounds = array<i64: 128, 128>}, {pipeline_mode = #tpu.pipeline_mode<synchronous>, transform_indices = @transform_3, window_bounds = array<i64: 1, 128>}, {pipeline_mode = #tpu.pipeline_mode<synchronous>, transform_indices = @transform_4, window_bounds = array<i64: 128, 128>}, {pipeline_mode = #tpu.pipeline_mode<synchronous>, transform_indices = @transform_5, window_bounds = array<i64: 1, 128>}, {transform_indices = @transform_6, window_bounds = array<i64: 8, 128>}]} {
    %c0 = arith.constant 0 : index
    %c0_0 = arith.constant 0 : index
    %0 = vector.load %arg1[%c0, %c0_0] : memref<2048x128xbf16, #tpu.memory_space<vmem>>, vector<2048x128xbf16>
    %c0_1 = arith.constant 0 : index
    %c0_2 = arith.constant 0 : index
    %1 = vector.load %arg3[%c0_1, %c0_2] : memref<128x128xbf16, #tpu.memory_space<vmem>>, vector<128x128xbf16>
    %cst = arith.constant dense<0.000000e+00> : vector<2048x128xf32>
    %2 = tpu.matmul %0, %1, %cst {dimension_numbers = #tpu.dot_dimension_numbers<[1], [0], [0], [1], [0, 0, 1, 1], [], []>} : vector<2048x128xbf16>, vector<128x128xbf16>, vector<2048x128xf32> -> vector<2048x128xf32>
    %c0_3 = arith.constant 0 : index
    %c0_4 = arith.constant 0 : index
    %3 = vector.load %arg4[%c0_3, %c0_4] : memref<1x128xf32, #tpu.memory_space<vmem>>, vector<1x128xf32>
    %4 = vector.broadcast %3 : vector<1x128xf32> to vector<2048x128xf32>
    %5 = arith.addf %2, %4 : vector<2048x128xf32>
    %cst_5 = arith.constant 0.000000e+00 : f32
    %6 = vector.broadcast %cst_5 : f32 to vector<2048x128xf32>
    %7 = arith.maximumf %5, %6 : vector<2048x128xf32>
    %c0_6 = arith.constant 0 : index
    %c0_7 = arith.constant 0 : index
    %8 = vector.load %arg2[%c0_6, %c0_7] : memref<8x2048xf32, #tpu.memory_space<vmem>>, vector<8x2048xf32>
    %cst_8 = arith.constant dense<0.000000e+00> : vector<8x128xf32>
    %9 = tpu.matmul %8, %7, %cst_8 {dimension_numbers = #tpu.dot_dimension_numbers<[1], [0], [0], [1], [0, 0, 1, 1], [], []>} : vector<8x2048xf32>, vector<2048x128xf32>, vector<8x128xf32> -> vector<8x128xf32>
    %c0_9 = arith.constant 0 : index
    %c0_10 = arith.constant 0 : index
    %10 = vector.load %arg5[%c0_9, %c0_10] : memref<128x128xf32, #tpu.memory_space<vmem>>, vector<128x128xf32>
    %cst_11 = arith.constant dense<0.000000e+00> : vector<8x128xf32>
    %11 = tpu.matmul %9, %10, %cst_11 {dimension_numbers = #tpu.dot_dimension_numbers<[1], [0], [0], [1], [0, 0, 1, 1], [], []>} : vector<8x128xf32>, vector<128x128xf32>, vector<8x128xf32> -> vector<8x128xf32>
    %c0_12 = arith.constant 0 : index
    %c0_13 = arith.constant 0 : index
    %12 = vector.load %arg6[%c0_12, %c0_13] : memref<1x128xf32, #tpu.memory_space<vmem>>, vector<1x128xf32>
    %13 = vector.broadcast %12 : vector<1x128xf32> to vector<8x128xf32>
    %14 = arith.addf %11, %13 : vector<8x128xf32>
    %c0_14 = arith.constant 0 : index
    %c0_15 = arith.constant 0 : index
    %15 = vector.load %arg7[%c0_14, %c0_15] : memref<8x128xf32, #tpu.memory_space<vmem>>, vector<8x128xf32>
    tpu.vector_store %arg7[%c0_14, %c0_15], %14 {strides = array<i32>} : memref<8x128xf32, #tpu.memory_space<vmem>>, vector<8x128xf32>,
    return
  }
  func.func @transform_0(%arg0: i32) -> (i32, i32) {
    %c0_i32 = arith.constant 0 : i32
    %c0_i32_0 = arith.constant 0 : i32
    return %arg0, %c0_i32 : i32, i32
  }
  func.func @transform_1(%arg0: i32) -> (i32, i32) {
    %c0_i32 = arith.constant 0 : i32
    %c0_i32_0 = arith.constant 0 : i32
    %c0_i32_1 = arith.constant 0 : i32
    return %c0_i32, %c0_i32_0 : i32, i32
  }
  func.func @transform_2(%arg0: i32) -> (i32, i32) {
    %c0_i32 = arith.constant 0 : i32
    %c0_i32_0 = arith.constant 0 : i32
    %c0_i32_1 = arith.constant 0 : i32
    return %c0_i32, %c0_i32_0 : i32, i32
  }
  func.func @transform_3(%arg0: i32) -> (i32, i32) {
    %c0_i32 = arith.constant 0 : i32
    %c0_i32_0 = arith.constant 0 : i32
    %c0_i32_1 = arith.constant 0 : i32
    return %c0_i32, %c0_i32_0 : i32, i32
  }
  func.func @transform_4(%arg0: i32) -> (i32, i32) {
    %c0_i32 = arith.constant 0 : i32
    %c0_i32_0 = arith.constant 0 : i32
    %c0_i32_1 = arith.constant 0 : i32
    return %c0_i32, %c0_i32_0 : i32, i32
  }
  func.func @transform_5(%arg0: i32) -> (i32, i32) {
    %c0_i32 = arith.constant 0 : i32
    %c0_i32_0 = arith.constant 0 : i32
    %c0_i32_1 = arith.constant 0 : i32
    return %c0_i32, %c0_i32_0 : i32, i32
  }
  func.func @transform_6(%arg0: i32) -> (i32, i32) {
    %c0_i32 = arith.constant 0 : i32
    %c0_i32_0 = arith.constant 0 : i32
    return %arg0, %c0_i32 : i32, i32
  }
}

</mosaic_0001>

<bundles_post_ra>
// kernel: lin_model_forward.1
= control target key start
LH: loop header
LB: loop body
LE: loop exit
PB: predicated region body
PF: predicated region fallthrough
CT: control target
= control target key end

     0   :  { %vm4422_vm0 = vmmov 0   ;;  %s5480_s2 = inlined_call_operand.vmem [shape: bf16[128,128], index: 2, kind: input, shape index: {}]   ;;  %s5481_s0 = inlined_call_operand.vmem [shape: bf16[2048,128], index: 0, kind: input, shape index: {}]   ;;  %s5482_s1 = inlined_call_operand.vmem [shape: f32[8,2048], index: 1, kind: input, shape index: {}]   ;;  %s5483_s3 = inlined_call_operand.vmem [shape: f32[1,128], index: 3, kind: input, shape index: {}]   ;;  %s5484_s4 = inlined_call_operand.vmem [shape: f32[128,128], index: 4, kind: input, shape index: {}]   ;;  %s5485_s5 = inlined_call_operand.vmem [shape: f32[1,128], index: 5, kind: input, shape index: {}]   ;;  %s5486_s6 = inlined_call_operand.vmem [shape: f32[8,128], index: 6, kind: output, shape index: {}]  }
   0x1   :  { %v4283_v0 = vld [vmem:[%s5480_s2] sm:$0xff]   ;;  %v4284_v1 = vld [vmem:[%s5480_s2 + $0x8] sm:$0xff]   ;;  %v4285_v2 = vld [vmem:[%s5480_s2 + $0x10] sm:$0xff]  }
   0x2   :  { %3677 = vmatprep.subr.bf16.mxu0 %v4283_v0  ;;  %4264 = vmatprep.subr.bf16.mxu1 %v4283_v0  ;;  %v4286_v3 = vld [vmem:[%s5480_s2 + $0x18] sm:$0xff]   ;;  %v4291_v4 = vld [vmem:[%s5481_s0] sm:$0xff]   ;;  %v4288_v6 = vld [vmem:[%s5480_s2 + $0x28] sm:$0xff]  }
   0x3   :  { %3678 = vmatpush3.bf16.msra.mxu0 %v4283_v0  ;;  %4272 = vmatpush3.bf16.msra.mxu1 %v4283_v0  ;;  %v4287_v5 = vld [vmem:[%s5480_s2 + $0x20] sm:$0xff]   ;;  %v4289_v7 = vld [vmem:[%s5480_s2 + $0x30] sm:$0xff]   ;;  %v4290_v8 = vld [vmem:[%s5480_s2 + $0x38] sm:$0xff]  }
   0x4   :  { %3679 = vmatprep.subr.bf16.mxu0 %v4284_v1  ;;  %4265 = vmatprep.subr.bf16.mxu1 %v4284_v1  ;;  %v4292_v9 = vld [vmem:[%s5481_s0 + $0x8] sm:$0xff]   ;;  %v4293_v10 = vld [vmem:[%s5481_s0 + $0x10] sm:$0xff]   ;;  %v4294_v11 = vld [vmem:[%s5481_s0 + $0x18] sm:$0xff]  }
   0x5   :  { %3693 = vmatprep.mubr.bf16.mxu0 %v4291_v4  ;;  %v4295_v12 = vld [vmem:[%s5481_s0 + $0x20] sm:$0xff]   ;;  %v4296_v13 = vld [vmem:[%s5481_s0 + $0x28] sm:$0xff]   ;;  %v4297_v14 = vld [vmem:[%s5481_s0 + $0x30] sm:$0xff]  }
   0x6   :  { %v4298_v15 = vld [vmem:[%s5481_s0 + $0x38] sm:$0xff]   ;;  %v4299_v16 = vld [vmem:[%s5481_s0 + $0x40] sm:$0xff]   ;;  %v4300_v17 = vld [vmem:[%s5481_s0 + $0x48] sm:$0xff]  }
   0x7   :  { %3680 = vmatpush3.bf16.msra.mxu0 %v4284_v1  ;;  %4273 = vmatpush3.bf16.msra.mxu1 %v4284_v1  ;;  %v4301_v18 = vld [vmem:[%s5481_s0 + $0x50] sm:$0xff]   ;;  %v4302_v19 = vld [vmem:[%s5481_s0 + $0x58] sm:$0xff]   ;;  %v4303_v20 = vld [vmem:[%s5481_s0 + $0x60] sm:$0xff]  }
   0x8   :  { %3681 = vmatprep.subr.bf16.mxu0 %v4285_v2  ;;  %4266 = vmatprep.subr.bf16.mxu1 %v4285_v2  ;;  %v4304_v21 = vld [vmem:[%s5481_s0 + $0x68] sm:$0xff]   ;;  %v4305_v22 = vld [vmem:[%s5481_s0 + $0x70] sm:$0xff]   ;;  %v4306_v23 = vld [vmem:[%s5481_s0 + $0x78] sm:$0xff]  }
   0x9   :  { %v4307_v24 = vld [vmem:[%s5481_s0 + $0x80] sm:$0xff]   ;;  %v4308_v25 = vld [vmem:[%s5481_s0 + $0x88] sm:$0xff]   ;;  %v4309_v26 = vld [vmem:[%s5481_s0 + $0x90] sm:$0xff]  }
   0xa   :  { %v4341_v27 = vld [vmem:[%s5481_s0 + $0x310] sm:$0xff]   ;;  %v4342_v28 = vld [vmem:[%s5481_s0 + $0x318] sm:$0xff]   ;;  %v4311_v30 = vld [vmem:[%s5481_s0 + $0xa0] sm:$0xff]  }
   0xb   :  { %3682 = vmatpush3.bf16.msra.mxu0 %v4285_v2  ;;  %4274 = vmatpush3.bf16.msra.mxu1 %v4285_v2  ;;  %v4310_v29 = vld [vmem:[%s5481_s0 + $0x98] sm:$0xff]   ;;  %v4345_v31 = vld [vmem:[%s5481_s0 + $0x320] sm:$0xff]   ;;  %v4346_v32 = vld [vmem:[%s5481_s0 + $0x328] sm:$0xff]  }
   0xc   :  { %3683 = vmatprep.subr.bf16.mxu0 %v4286_v3  ;;  %4267 = vmatprep.subr.bf16.mxu1 %v4286_v3  ;;  %v4312_v33 = vld [vmem:[%s5481_s0 + $0xa8] sm:$0xff]   ;;  %v4313_v34 = vld [vmem:[%s5481_s0 + $0xb0] sm:$0xff]   ;;  %v4314_v36 = vld [vmem:[%s5481_s0 + $0xb8] sm:$0xff]  }
   0xd   :  { %3889 = vmatprep.mubr.bf16.mxu1 %v4341_v27  ;;  %v4349_v35 = vld [vmem:[%s5481_s0 + $0x330] sm:$0xff]   ;;  %v4350_v37 = vld [vmem:[%s5481_s0 + $0x338] sm:$0xff]   ;;  %v4315_v38 = vld [vmem:[%s5481_s0 + $0xc0] sm:$0xff]  }
   0xe   :  { %v4353_v39 = vld [vmem:[%s5481_s0 + $0x340] sm:$0xff]   ;;  %v4316_v40 = vld [vmem:[%s5481_s0 + $0xc8] sm:$0xff]   ;;  %v4317_v42 = vld [vmem:[%s5481_s0 + $0xd0] sm:$0xff]  }
   0xf   :  { %3684 = vmatpush3.bf16.msra.mxu0 %v4286_v3  ;;  %4275 = vmatpush3.bf16.msra.mxu1 %v4286_v3  ;;  %v4354_v41 = vld [vmem:[%s5481_s0 + $0x348] sm:$0xff]   ;;  %v4357_v43 = vld [vmem:[%s5481_s0 + $0x350] sm:$0xff]   ;;  %v4318_v44 = vld [vmem:[%s5481_s0 + $0xd8] sm:$0xff]  }
  0x10   :  { %3685 = vmatprep.subr.bf16.mxu0 %v4287_v5  ;;  %4268 = vmatprep.subr.bf16.mxu1 %v4287_v5  ;;  %v4358_v45 = vld [vmem:[%s5481_s0 + $0x358] sm:$0xff]   ;;  %v4319_v46 = vld [vmem:[%s5481_s0 + $0xe0] sm:$0xff]   ;;  %v4320_v48 = vld [vmem:[%s5481_s0 + $0xe8] sm:$0xff]  }
  0x11   :  { %v4361_v47 = vld [vmem:[%s5481_s0 + $0x360] sm:$0xff]   ;;  %v4362_v49 = vld [vmem:[%s5481_s0 + $0x368] sm:$0xff]   ;;  %v4321_v50 = vld [vmem:[%s5481_s0 + $0xf0] sm:$0xff]  }
  0x12   :  { %v4365_v51 = vld [vmem:[%s5481_s0 + $0x370] sm:$0xff]   ;;  %v4322_v52 = vld [vmem:[%s5481_s0 + $0xf8] sm:$0xff]   ;;  %v4323_v54 = vld [vmem:[%s5481_s0 + $0x100] sm:$0xff]  }
  0x13   :  { %3686 = vmatpush3.bf16.msra.mxu0 %v4287_v5  ;;  %4276 = vmatpush3.bf16.msra.mxu1 %v4287_v5  ;;  %v4366_v53 = vld [vmem:[%s5481_s0 + $0x378] sm:$0xff]   ;;  %v4369_v55 = vld [vmem:[%s5481_s0 + $0x380] sm:$0xff]   ;;  %v4324_v56 = vld [vmem:[%s5481_s0 + $0x108] sm:$0xff]  }
  0x14   :  { %3687 = vmatprep.subr.bf16.mxu0 %v4288_v6  ;;  %4269 = vmatprep.subr.bf16.mxu1 %v4288_v6  ;;  %v4370_v57 = vld [vmem:[%s5481_s0 + $0x388] sm:$0xff]   ;;  %v4325_v58 = vld [vmem:[%s5481_s0 + $0x110] sm:$0xff]   ;;  %v4326_v60 = vld [vmem:[%s5481_s0 + $0x118] sm:$0xff]  }
  0x15   :  { %v4373_v59 = vld [vmem:[%s5481_s0 + $0x390] sm:$0xff]   ;;  %v4374_v61 = vld [vmem:[%s5481_s0 + $0x398] sm:$0xff]   ;;  %v4327_v62 = vld [vmem:[%s5481_s0 + $0x120] sm:$0xff]  }
  0x16   :  { %v4377_v63 = vld [vmem:[%s5481_s0 + $0x3a0] sm:$0xff]   ;;  %v4328_v0 = vld [vmem:[%s5481_s0 + $0x128] sm:$0xff]   ;;  %v4329_v2 = vld [vmem:[%s5481_s0 + $0x130] sm:$0xff]  }
  0x17   :  { %3688 = vmatpush3.bf16.msra.mxu0 %v4288_v6  ;;  %4277 = vmatpush3.bf16.msra.mxu1 %v4288_v6  ;;  %v4378_v1 = vld [vmem:[%s5481_s0 + $0x3a8] sm:$0xff]   ;;  %v4381_v3 = vld [vmem:[%s5481_s0 + $0x3b0] sm:$0xff]   ;;  %v4330_v4 = vld [vmem:[%s5481_s0 + $0x138] sm:$0xff]  }
  0x18   :  { %3689 = vmatprep.subr.bf16.mxu0 %v4289_v7  ;;  %4270 = vmatprep.subr.bf16.mxu1 %v4289_v7  ;;  %v4382_v5 = vld [vmem:[%s5481_s0 + $0x3b8] sm:$0xff]   ;;  %v4331_v6 = vld [vmem:[%s5481_s0 + $0x140] sm:$0xff]  }
  0x19   :  { %v4347_v27 = vld [vmem:[%s5481_s0 + $0x1a0] sm:$0xff]  }
  0x1b   :  { %3690 = vmatpush3.bf16.msra.mxu0 %v4289_v7  ;;  %4278 = vmatpush3.bf16.msra.mxu1 %v4289_v7  ;;  %v4385_v7 = vld [vmem:[%s5481_s0 + $0x3c0] sm:$0xff]  }
  0x1c   :  { %3691 = vmatprep.subr.bf16.mxu0 %v4290_v8  ;;  %4271 = vmatprep.subr.bf16.mxu1 %v4290_v8 }
  0x1f   :  { %3692 = vmatpush3.bf16.msra.mxu0 %v4290_v8  ;;  %4279 = vmatpush3.bf16.msra.mxu1 %v4290_v8  ;;  %v4332_v8 = vld [vmem:[%s5481_s0 + $0x148] sm:$0xff]  }
  0x22   :  { %3694 = vmatmul.mubr.bf16.vlgmr.msra.gmra.mrb[0].mxu0 %v4292_v9  ;;  %3890 = vmatmul.mubr.bf16.vlgmr.msra.gmra.mrb[0].mxu1 %v4342_v28  ;;  %v4386_v9 = vld [vmem:[%s5481_s0 + $0x3c8] sm:$0xff]  }
  0x23   :  { %3697 = vmatprep.mubr.bf16.mxu0 %v4293_v10  ;;  %3893 = vmatprep.mubr.bf16.mxu1 %v4345_v31  ;;  %v4333_v10 = vld [vmem:[%s5481_s0 + $0x150] sm:$0xff]   ;;  %v4348_v28 = vld [vmem:[%s5481_s0 + $0x1a8] sm:$0xff]  }
  0x2a   :  { %3698 = vmatmul.mubr.bf16.gmra.mrb[4].mxu0 %v4294_v11  ;;  %3894 = vmatmul.mubr.bf16.gmra.mrb[4].mxu1 %v4346_v32  ;;  %v4389_v11 = vld [vmem:[%s5481_s0 + $0x3d0] sm:$0xff]  }
  0x2b   :  { %3701 = vmatprep.mubr.bf16.mxu0 %v4295_v12  ;;  %3897 = vmatprep.mubr.bf16.mxu1 %v4349_v35  ;;  %v4334_v12 = vld [vmem:[%s5481_s0 + $0x158] sm:$0xff]  }
  0x32   :  { %3702 = vmatmul.mubr.bf16.gmra.mrb[8].mxu0 %v4296_v13  ;;  %3898 = vmatmul.mubr.bf16.gmra.mrb[8].mxu1 %v4350_v37  ;;  %v4390_v13 = vld [vmem:[%s5481_s0 + $0x3d8] sm:$0xff]   ;;  %v4355_v37 = vld [vmem:[%s5481_s0 + $0x1c0] sm:$0xff]  }
  0x33   :  { %3705 = vmatprep.mubr.bf16.mxu0 %v4297_v14  ;;  %3901 = vmatprep.mubr.bf16.mxu1 %v4353_v39  ;;  %v4335_v14 = vld [vmem:[%s5481_s0 + $0x160] sm:$0xff]  }
  0x3a   :  { %3706 = vmatmul.mubr.bf16.gmra.mrb[12].mxu0 %v4298_v15  ;;  %3902 = vmatmul.mubr.bf16.gmra.mrb[12].mxu1 %v4354_v41  ;;  %v4393_v15 = vld [vmem:[%s5481_s0 + $0x3e0] sm:$0xff]  }
  0x3b   :  { %3709 = vmatprep.mubr.bf16.mxu0 %v4299_v16  ;;  %3905 = vmatprep.mubr.bf16.mxu1 %v4357_v43  ;;  %v4336_v16 = vld [vmem:[%s5481_s0 + $0x168] sm:$0xff]  }
  0x42   :  { %3710 = vmatmul.mubr.bf16.gmra.mrb[16].mxu0 %v4300_v17  ;;  %3906 = vmatmul.mubr.bf16.gmra.mrb[16].mxu1 %v4358_v45  ;;  %v4394_v17 = vld [vmem:[%s5481_s0 + $0x3e8] sm:$0xff]  }
  0x43   :  { %3713 = vmatprep.mubr.bf16.mxu0 %v4301_v18  ;;  %3909 = vmatprep.mubr.bf16.mxu1 %v4361_v47  ;;  %v4337_v18 = vld [vmem:[%s5481_s0 + $0x170] sm:$0xff]  }
  0x4a   :  { %3714 = vmatmul.mubr.bf16.gmra.mrb[20].mxu0 %v4302_v19  ;;  %3910 = vmatmul.mubr.bf16.gmra.mrb[20].mxu1 %v4362_v49  ;;  %v4397_v19 = vld [vmem:[%s5481_s0 + $0x3f0] sm:$0xff]  }
  0x4b   :  { %3717 = vmatprep.mubr.bf16.mxu0 %v4303_v20  ;;  %3913 = vmatprep.mubr.bf16.mxu1 %v4365_v51  ;;  %v4338_v20 = vld [vmem:[%s5481_s0 + $0x178] sm:$0xff]  }
  0x52   :  { %3718 = vmatmul.mubr.bf16.gmra.mrb[24].mxu0 %v4304_v21  ;;  %3914 = vmatmul.mubr.bf16.gmra.mrb[24].mxu1 %v4366_v53  ;;  %v4398_v21 = vld [vmem:[%s5481_s0 + $0x3f8] sm:$0xff]   ;;  %v4359_v53 = vld [vmem:[%s5481_s0 + $0x1d0] sm:$0xff]  }
  0x53   :  { %3721 = vmatprep.mubr.bf16.mxu0 %v4305_v22  ;;  %3917 = vmatprep.mubr.bf16.mxu1 %v4369_v55  ;;  %v4339_v22 = vld [vmem:[%s5481_s0 + $0x180] sm:$0xff]  }
  0x5a   :  { %3722 = vmatmul.mubr.bf16.gmra.mrb[28].mxu0 %v4306_v23  ;;  %3918 = vmatmul.mubr.bf16.gmra.mrb[28].mxu1 %v4370_v57  ;;  %v4340_v23 = vld [vmem:[%s5481_s0 + $0x188] sm:$0xff]  }
  0x5b   :  { %3725 = vmatprep.mubr.bf16.mxu0 %v4307_v24  ;;  %3921 = vmatprep.mubr.bf16.mxu1 %v4373_v59  ;;  %v2433_v24 = vld [vmem:[%s5482_s1 + $0x8] sm:$0xff] }
  0x62   :  { %3726 = vmatmul.mubr.bf16.gmra.mrb[32].mxu0 %v4308_v25  ;;  %3922 = vmatmul.mubr.bf16.gmra.mrb[32].mxu1 %v4374_v61  ;;  %v4343_v25 = vld [vmem:[%s5481_s0 + $0x190] sm:$0xff]  }
  0x63   :  { %3729 = vmatprep.mubr.bf16.mxu0 %v4309_v26  ;;  %3925 = vmatprep.mubr.bf16.mxu1 %v4377_v63  ;;  %v4344_v26 = vld [vmem:[%s5481_s0 + $0x198] sm:$0xff]  }
  0x6a   :  { %3730 = vmatmul.mubr.bf16.gmra.mrb[36].mxu0 %v4310_v29  ;;  %3926 = vmatmul.mubr.bf16.gmra.mrb[36].mxu1 %v4378_v1  ;;  %v4351_v29 = vld [vmem:[%s5481_s0 + $0x1b0] sm:$0xff]  }
  0x6b   :  { %3733 = vmatprep.mubr.bf16.mxu0 %v4311_v30  ;;  %3929 = vmatprep.mubr.bf16.mxu1 %v4381_v3  ;;  %v4744_v30 = vld [vmem:[%s5483_s3] ss:$0 sm:$0xff] }
  0x72   :  { %3734 = vmatmul.mubr.bf16.gmra.mrb[40].mxu0 %v4312_v33  ;;  %3930 = vmatmul.mubr.bf16.gmra.mrb[40].mxu1 %v4382_v5  ;;  %v4363_v5 = vld [vmem:[%s5481_s0 + $0x1e0] sm:$0xff]  }
  0x73   :  { %3737 = vmatprep.mubr.bf16.mxu0 %v4313_v34  ;;  %3933 = vmatprep.mubr.bf16.mxu1 %v4385_v7  ;;  %v4352_v34 = vld [vmem:[%s5481_s0 + $0x1b8] sm:$0xff]  }
  0x7a   :  { %3738 = vmatmul.mubr.bf16.gmra.mrb[44].mxu0 %v4314_v36  ;;  %3934 = vmatmul.mubr.bf16.gmra.mrb[44].mxu1 %v4386_v9 }
  0x7b   :  { %3741 = vmatprep.mubr.bf16.mxu0 %v4315_v38  ;;  %3937 = vmatprep.mubr.bf16.mxu1 %v4389_v11 }
  0x82   :  { %3742 = vmatmul.mubr.bf16.gmra.mrb[48].mxu0 %v4316_v40  ;;  %3938 = vmatmul.mubr.bf16.gmra.mrb[48].mxu1 %v4390_v13 }
  0x83   :  { %3745 = vmatprep.mubr.bf16.mxu0 %v4317_v42  ;;  %3941 = vmatprep.mubr.bf16.mxu1 %v4393_v15 }
  0x8a   :  { %3746 = vmatmul.mubr.bf16.gmra.mrb[52].mxu0 %v4318_v44  ;;  %3942 = vmatmul.mubr.bf16.gmra.mrb[52].mxu1 %v4394_v17 }
  0x8b   :  { %3749 = vmatprep.mubr.bf16.mxu0 %v4319_v46  ;;  %3945 = vmatprep.mubr.bf16.mxu1 %v4397_v19 }
  0x92   :  { %3750 = vmatmul.mubr.bf16.gmra.mrb[56].mxu0 %v4320_v48  ;;  %3946 = vmatmul.mubr.bf16.gmra.mrb[56].mxu1 %v4398_v21  ;;  %v4367_v21 = vld [vmem:[%s5481_s0 + $0x1f0] sm:$0xff]  }
  0x93   :  { %3753 = vmatprep.mubr.bf16.mxu0 %v4321_v50  ;;  %2512 = vmatprep.mubr.f32.mxu1 %v2433_v24  ;;  %v4356_v50 = vld [vmem:[%s5481_s0 + $0x1c8] sm:$0xff]  }
  0x9a   :  { %3754 = vmatmul.mubr.bf16.gmra.mrb[60].mxu0 %v4322_v52 }
  0x9b   :  { %3757 = vmatprep.mubr.bf16.mxu0 %v4323_v54 }
  0xa2   :  { %3758 = vmatmul.mubr.bf16.gmra.mrb[64].mxu0 %v4324_v56 }
  0xa3   :  { %3761 = vmatprep.mubr.bf16.mxu0 %v4325_v58 }
  0xaa   :  { %3762 = vmatmul.mubr.bf16.gmra.mrb[68].mxu0 %v4326_v60 }
  0xab   :  { %3765 = vmatprep.mubr.bf16.mxu0 %v4327_v62 }
  0xb2   :  { %3766 = vmatmul.mubr.bf16.gmra.mrb[72].mxu0 %v4328_v0 }
  0xb3   :  { %3769 = vmatprep.mubr.bf16.mxu0 %v4329_v2  ;;  %v4360_v2 = vld [vmem:[%s5481_s0 + $0x1d8] sm:$0xff]  }
  0xba   :  { %3770 = vmatmul.mubr.bf16.gmra.mrb[76].mxu0 %v4330_v4 }
  0xbb   :  { %3773 = vmatprep.mubr.bf16.mxu0 %v4331_v6 }
  0xc2   :  { %3774 = vmatmul.mubr.bf16.gmra.mrb[80].mxu0 %v4332_v8 }
  0xc3   :  { %3777 = vmatprep.mubr.bf16.mxu0 %v4333_v10 }
  0xca   :  { %3778 = vmatmul.mubr.bf16.gmra.mrb[84].mxu0 %v4334_v12 }
  0xcb   :  { %3781 = vmatprep.mubr.bf16.mxu0 %v4335_v14 }
  0xd2   :  { %3782 = vmatmul.mubr.bf16.gmra.mrb[88].mxu0 %v4336_v16 }
  0xd3   :  { %3785 = vmatprep.mubr.bf16.mxu0 %v4337_v18  ;;  %v4364_v18 = vld [vmem:[%s5481_s0 + $0x1e8] sm:$0xff]  }
  0xda   :  { %3786 = vmatmul.mubr.bf16.gmra.mrb[92].mxu0 %v4338_v20 }
  0xdb   :  { %3789 = vmatprep.mubr.bf16.mxu0 %v4339_v22 }
  0xe2   :  { %3790 = vmatmul.mubr.bf16.gmra.mrb[96].mxu0 %v4340_v23 }
  0xe3   :  { %3793 = vmatprep.mubr.bf16.mxu0 %v4343_v25 }
  0xea   :  { %3794 = vmatmul.mubr.bf16.gmra.mrb[100].mxu0 %v4344_v26 }
  0xeb   :  { %3797 = vmatprep.mubr.bf16.mxu0 %v4347_v27 }
  0xf2   :  { %3798 = vmatmul.mubr.bf16.gmra.mrb[104].mxu0 %v4348_v28 }
  0xf3   :  { %3801 = vmatprep.mubr.bf16.mxu0 %v4351_v29 }
  0xf5   :  { %v3695_v31 = vpop.f32.mrb[0].mxu0 }
  0xf6   :  { %v1162_v32 = vadd.f32 %v3695_v31, %v4744_v30  ;;  %v1153_v33 = vpop.f32.mrb[1].mxu0 }
  0xf7   :  { %v1154_v35 = vadd.f32 %v4744_v30, %v1153_v33  ;;  %v3696_v36 = vpop.f32.mrb[2].mxu0 }
  0xf8   :  { %v1165_v38 = vadd.f32 %v3696_v36, %v4744_v30  ;;  %v1156_v39 = vpop.f32.mrb[3].mxu0  ;;  %v2178_v41 = vmax.f32 %v1162_v32, 0.0 }
  0xf9   :  { %v1157_v40 = vadd.f32 %v4744_v30, %v1156_v39  ;;  %v2176_v43 = vmax.f32 %v1154_v35, 0.0  ;;  %v4368_v35 = vld [vmem:[%s5481_s0 + $0x1f8] sm:$0xff]  }
  0xfa   :  { %v2179_v42 = vmax.f32 %v1165_v38, 0.0  ;;  %3802 = vmatmul.mubr.bf16.gmra.mrb[108].mxu0 %v4352_v34  ;;  %v4371_v38 = vld [vmem:[%s5481_s0 + $0x200] sm:$0xff]  }
  0xfb   :  { %v2177_v44 = vmax.f32 %v1157_v40, 0.0  ;;  %3805 = vmatprep.mubr.bf16.mxu0 %v4355_v37 }
  0xfc   :  { %v4756_v45 = vpack.c.bf16 %v2179_v42, %v2178_v41 }
  0xfd   :  { %v4758_v46 = vpack.c.bf16 %v2177_v44, %v2176_v43  ;;  %v3699_v47 = vpop.f32.mrb[4].mxu0 }
  0xfe   :  { %v1178_v48 = vadd.f32 %v3699_v47, %v4744_v30  ;;  %v1169_v49 = vpop.f32.mrb[5].mxu0 }
  0xff   :  { %v1170_v51 = vadd.f32 %v4744_v30, %v1169_v49  ;;  %v3700_v52 = vpop.f32.mrb[6].mxu0 }
 0x100   :  { %v1181_v54 = vadd.f32 %v3700_v52, %v4744_v30  ;;  %v1172_v55 = vpop.f32.mrb[7].mxu0  ;;  %v2182_v57 = vmax.f32 %v1178_v48, 0.0 }
 0x101   :  { %v1173_v56 = vadd.f32 %v4744_v30, %v1172_v55  ;;  %v2180_v59 = vmax.f32 %v1170_v51, 0.0 }
 0x102   :  { %v2183_v58 = vmax.f32 %v1181_v54, 0.0  ;;  %3806 = vmatmul.mubr.bf16.gmra.mrb[112].mxu0 %v4356_v50 }
 0x103   :  { %v2181_v60 = vmax.f32 %v1173_v56, 0.0  ;;  %3809 = vmatprep.mubr.bf16.mxu0 %v4359_v53  ;;  %v4372_v53 = vld [vmem:[%s5481_s0 + $0x208] sm:$0xff]   ;;  %v4375_v56 = vld [vmem:[%s5481_s0 + $0x210] sm:$0xff]  }
 0x104   :  { %v4770_v61 = vpack.c.bf16 %v2183_v58, %v2182_v57 }
 0x105   :  { %v4772_v62 = vpack.c.bf16 %v2181_v60, %v2180_v59  ;;  %v3703_v63 = vpop.f32.mrb[8].mxu0 }
 0x106   :  { %v1194_v0 = vadd.f32 %v3703_v63, %v4744_v30  ;;  %v1185_v1 = vpop.f32.mrb[9].mxu0 }
 0x107   :  { %v1186_v3 = vadd.f32 %v4744_v30, %v1185_v1  ;;  %v3704_v4 = vpop.f32.mrb[10].mxu0 }
 0x108   :  { %v1197_v6 = vadd.f32 %v3704_v4, %v4744_v30  ;;  %v1188_v7 = vpop.f32.mrb[11].mxu0  ;;  %v2186_v9 = vmax.f32 %v1194_v0, 0.0 }
 0x109   :  { %v1189_v8 = vadd.f32 %v4744_v30, %v1188_v7  ;;  %v2184_v11 = vmax.f32 %v1186_v3, 0.0 }
 0x10a   :  { %v2187_v10 = vmax.f32 %v1197_v6, 0.0  ;;  %3810 = vmatmul.mubr.bf16.gmra.mrb[116].mxu0 %v4360_v2 }
 0x10b   :  { %v2185_v12 = vmax.f32 %v1189_v8, 0.0  ;;  %3813 = vmatprep.mubr.bf16.mxu0 %v4363_v5 }
 0x10c   :  { %v4784_v13 = vpack.c.bf16 %v2187_v10, %v2186_v9  ;;  %v4379_v9 = vld [vmem:[%s5481_s0 + $0x220] sm:$0xff]  }
 0x10d   :  { %v4786_v14 = vpack.c.bf16 %v2185_v12, %v2184_v11  ;;  %v3707_v15 = vpop.f32.mrb[12].mxu0 }
 0x10e   :  { %v1210_v16 = vadd.f32 %v3707_v15, %v4744_v30  ;;  %v1201_v17 = vpop.f32.mrb[13].mxu0 }
 0x10f   :  { %v1202_v19 = vadd.f32 %v4744_v30, %v1201_v17  ;;  %v3708_v20 = vpop.f32.mrb[14].mxu0 }
 0x110   :  { %v1213_v22 = vadd.f32 %v3708_v20, %v4744_v30  ;;  %v1204_v23 = vpop.f32.mrb[15].mxu0  ;;  %v2190_v25 = vmax.f32 %v1210_v16, 0.0 }
 0x111   :  { %v1205_v24 = vadd.f32 %v4744_v30, %v1204_v23  ;;  %v2188_v27 = vmax.f32 %v1202_v19, 0.0 }
 0x112   :  { %v2191_v26 = vmax.f32 %v1213_v22, 0.0  ;;  %3814 = vmatmul.mubr.bf16.gmra.mrb[120].mxu0 %v4364_v18 }
 0x113   :  { %v2189_v28 = vmax.f32 %v1205_v24, 0.0  ;;  %3817 = vmatprep.mubr.bf16.mxu0 %v4367_v21 }
 0x114   :  { %v4798_v29 = vpack.c.bf16 %v2191_v26, %v2190_v25  ;;  %v4383_v25 = vld [vmem:[%s5481_s0 + $0x230] sm:$0xff]  }
 0x115   :  { %v4800_v31 = vpack.c.bf16 %v2189_v28, %v2188_v27  ;;  %v3711_v32 = vpop.f32.mrb[16].mxu0 }
 0x116   :  { %v1226_v33 = vadd.f32 %v3711_v32, %v4744_v30  ;;  %v1217_v34 = vpop.f32.mrb[17].mxu0 }
 0x117   :  { %v1218_v36 = vadd.f32 %v4744_v30, %v1217_v34  ;;  %v3712_v37 = vpop.f32.mrb[18].mxu0 }
 0x118   :  { %v1229_v39 = vadd.f32 %v3712_v37, %v4744_v30  ;;  %v1220_v40 = vpop.f32.mrb[19].mxu0  ;;  %v2194_v42 = vmax.f32 %v1226_v33, 0.0 }
 0x119   :  { %v1221_v41 = vadd.f32 %v4744_v30, %v1220_v40  ;;  %v2192_v44 = vmax.f32 %v1218_v36, 0.0 }
 0x11a   :  { %v2195_v43 = vmax.f32 %v1229_v39, 0.0  ;;  %3818 = vmatmul.mubr.bf16.gmra.mrb[124].mxu0 %v4368_v35 }
 0x11b   :  { %v2193_v47 = vmax.f32 %v1221_v41, 0.0  ;;  %3821 = vmatprep.mubr.bf16.mxu0 %v4371_v38 }
 0x11c   :  { %v3988_v48 = vpack.c.bf16 %v2195_v43, %v2194_v42  ;;  %v4387_v42 = vld [vmem:[%s5481_s0 + $0x240] sm:$0xff]  }
 0x11d   :  { %v3984_v49 = vpack.c.bf16 %v2193_v47, %v2192_v44  ;;  %v3715_v50 = vpop.f32.mrb[20].mxu0 }
 0x11e   :  { %v1242_v51 = vadd.f32 %v3715_v50, %v4744_v30  ;;  %v1233_v52 = vpop.f32.mrb[21].mxu0 }
 0x11f   :  { %v1234_v54 = vadd.f32 %v4744_v30, %v1233_v52  ;;  %v3716_v55 = vpop.f32.mrb[22].mxu0  ;;  %3985 = vmatprep.subr.bf16.mxu1 %v3984_v49  ;;  %v2432_v52 = vld [vmem:[%s5482_s1] sm:$0xff] }
 0x120   :  { %v1245_v57 = vadd.f32 %v3716_v55, %v4744_v30  ;;  %v1236_v58 = vpop.f32.mrb[23].mxu0  ;;  %3987 = vmatpush3.bf16.msra.mxu1 %v4758_v46  ;;  %v2198_v60 = vmax.f32 %v1242_v51, 0.0  ;;  %v4376_v46 = vld [vmem:[%s5481_s0 + $0x218] sm:$0xff]  }
 0x121   :  { %v1237_v59 = vadd.f32 %v4744_v30, %v1236_v58  ;;  %3989 = vmatprep.subr.bf16.mxu1 %v3988_v48  ;;  %v2196_v0 = vmax.f32 %v1234_v54, 0.0  ;;  %v2435_v54 = vld [vmem:[%s5482_s1 + $0x18] sm:$0xff] }
 0x122   :  { %v2199_v63 = vmax.f32 %v1245_v57, 0.0  ;;  %3822 = vmatmul.mubr.bf16.gmra.mrb[128].mxu0 %v4372_v53  ;;  %v4388_v57 = vld [vmem:[%s5481_s0 + $0x248] sm:$0xff]  }
 0x123   :  { %v2197_v1 = vmax.f32 %v1237_v59, 0.0  ;;  %3825 = vmatprep.mubr.bf16.mxu0 %v4375_v56  ;;  %v4391_v59 = vld [vmem:[%s5481_s0 + $0x250] sm:$0xff]  }
 0x124   :  { %v3996_v2 = vpack.c.bf16 %v2199_v63, %v2198_v60  ;;  %3991 = vmatpush3.bf16.msra.mxu1 %v4756_v45 }
 0x125   :  { %v3992_v3 = vpack.c.bf16 %v2197_v1, %v2196_v0  ;;  %v3719_v4 = vpop.f32.mrb[24].mxu0 }
 0x126   :  { %v1258_v5 = vadd.f32 %v3719_v4, %v4744_v30  ;;  %v1249_v6 = vpop.f32.mrb[25].mxu0 }
 0x127   :  { %v1250_v7 = vadd.f32 %v4744_v30, %v1249_v6  ;;  %v3720_v8 = vpop.f32.mrb[26].mxu0  ;;  %3993 = vmatprep.subr.bf16.mxu1 %v3992_v3 }
 0x128   :  { %v1261_v10 = vadd.f32 %v3720_v8, %v4744_v30  ;;  %v1252_v45 = vpop.f32.mrb[27].mxu0  ;;  %3995 = vmatpush3.bf16.msra.mxu1 %v4772_v62  ;;  %v2202_v12 = vmax.f32 %v1258_v5, 0.0  ;;  %v4380_v62 = vld [vmem:[%s5481_s0 + $0x228] sm:$0xff]  }
 0x129   :  { %v1253_v11 = vadd.f32 %v4744_v30, %v1252_v45  ;;  %3997 = vmatprep.subr.bf16.mxu1 %v3996_v2  ;;  %v2200_v16 = vmax.f32 %v1250_v7, 0.0 }
 0x12a   :  { %v2203_v15 = vmax.f32 %v1261_v10, 0.0  ;;  %3826 = vmatmul.mubr.bf16.gmra.mrb[132].mxu0 %v4376_v46 }
 0x12b   :  { %v2201_v17 = vmax.f32 %v1253_v11, 0.0  ;;  %3829 = vmatprep.mubr.bf16.mxu0 %v4379_v9  ;;  %v4392_v9 = vld [vmem:[%s5481_s0 + $0x258] sm:$0xff]   ;;  %v4395_v11 = vld [vmem:[%s5481_s0 + $0x260] sm:$0xff]  }
 0x12c   :  { %v4004_v18 = vpack.c.bf16 %v2203_v15, %v2202_v12  ;;  %3999 = vmatpush3.bf16.msra.mxu1 %v4770_v61 }
 0x12d   :  { %v4000_v19 = vpack.c.bf16 %v2201_v17, %v2200_v16  ;;  %v3723_v20 = vpop.f32.mrb[28].mxu0 }
 0x12e   :  { %v1274_v21 = vadd.f32 %v3723_v20, %v4744_v30  ;;  %v1265_v22 = vpop.f32.mrb[29].mxu0 }
 0x12f   :  { %v1266_v23 = vadd.f32 %v4744_v30, %v1265_v22  ;;  %v3724_v24 = vpop.f32.mrb[30].mxu0  ;;  %4001 = vmatprep.subr.bf16.mxu1 %v4000_v19 }
 0x130   :  { %v1277_v26 = vadd.f32 %v3724_v24, %v4744_v30  ;;  %v1268_v61 = vpop.f32.mrb[31].mxu0  ;;  %4003 = vmatpush3.bf16.msra.mxu1 %v4786_v14  ;;  %v2206_v28 = vmax.f32 %v1274_v21, 0.0  ;;  %v4384_v14 = vld [vmem:[%s5481_s0 + $0x238] sm:$0xff]  }
 0x131   :  { %v1269_v27 = vadd.f32 %v4744_v30, %v1268_v61  ;;  %4005 = vmatprep.subr.bf16.mxu1 %v4004_v18  ;;  %v2204_v33 = vmax.f32 %v1266_v23, 0.0 }
 0x132   :  { %v2207_v32 = vmax.f32 %v1277_v26, 0.0  ;;  %3830 = vmatmul.mubr.bf16.gmra.mrb[136].mxu0 %v4380_v62 }
 0x133   :  { %v2205_v34 = vmax.f32 %v1269_v27, 0.0  ;;  %3833 = vmatprep.mubr.bf16.mxu0 %v4383_v25  ;;  %v4396_v25 = vld [vmem:[%s5481_s0 + $0x268] sm:$0xff]   ;;  %v4399_v27 = vld [vmem:[%s5481_s0 + $0x270] sm:$0xff]  }
 0x134   :  { %v4012_v35 = vpack.c.bf16 %v2207_v32, %v2206_v28  ;;  %4007 = vmatpush3.bf16.msra.mxu1 %v4784_v13 }
 0x135   :  { %v4008_v36 = vpack.c.bf16 %v2205_v34, %v2204_v33  ;;  %v3727_v37 = vpop.f32.mrb[32].mxu0 }
 0x136   :  { %v1290_v38 = vadd.f32 %v3727_v37, %v4744_v30  ;;  %v1281_v39 = vpop.f32.mrb[33].mxu0 }
 0x137   :  { %v1282_v40 = vadd.f32 %v4744_v30, %v1281_v39  ;;  %v3728_v41 = vpop.f32.mrb[34].mxu0  ;;  %4009 = vmatprep.subr.bf16.mxu1 %v4008_v36 }
 0x138   :  { %v1293_v43 = vadd.f32 %v3728_v41, %v4744_v30  ;;  %v1284_v13 = vpop.f32.mrb[35].mxu0  ;;  %4011 = vmatpush3.bf16.msra.mxu1 %v4800_v31  ;;  %v2210_v47 = vmax.f32 %v1290_v38, 0.0 }
 0x139   :  { %v1285_v44 = vadd.f32 %v4744_v30, %v1284_v13  ;;  %4013 = vmatprep.subr.bf16.mxu1 %v4012_v35  ;;  %v2208_v49 = vmax.f32 %v1282_v40, 0.0 }
 0x13a   :  { %v2211_v48 = vmax.f32 %v1293_v43, 0.0  ;;  %3834 = vmatmul.mubr.bf16.gmra.mrb[140].mxu0 %v4384_v14 }
 0x13b   :  { %v2209_v50 = vmax.f32 %v1285_v44, 0.0  ;;  %3837 = vmatprep.mubr.bf16.mxu0 %v4387_v42  ;;  %v4400_v42 = vld [vmem:[%s5481_s0 + $0x278] sm:$0xff]   ;;  %v4401_v44 = vld [vmem:[%s5481_s0 + $0x280] sm:$0xff]  }
 0x13c   :  { %v4859_v51 = vpack.c.bf16 %v2211_v48, %v2210_v47  ;;  %4015 = vmatpush3.bf16.msra.mxu1 %v4798_v29 }
 0x13d   :  { %v4865_v53 = vpack.c.bf16 %v2209_v50, %v2208_v49  ;;  %v3731_v31 = vpop.f32.mrb[36].mxu0 }
 0x13e   :  { %v1306_v55 = vadd.f32 %v3731_v31, %v4744_v30  ;;  %v1297_v56 = vpop.f32.mrb[37].mxu0 }
 0x13f   :  { %v1298_v29 = vadd.f32 %v4744_v30, %v1297_v56  ;;  %v3732_v58 = vpop.f32.mrb[38].mxu0  ;;  %2513 = vmatmul.mubr.f32.vlgmr.msra.gmra.mrb[60].mxu1 %v2432_v52 }
 0x140   :  { %v1309_v60 = vadd.f32 %v3732_v58, %v4744_v30  ;;  %v1300_v63 = vpop.f32.mrb[39].mxu0  ;;  %2582 = vmatprep.mubr.f32.mxu1 %v2435_v54  ;;  %v2214_v1 = vmax.f32 %v1306_v55, 0.0 }
 0x141   :  { %v1301_v0 = vadd.f32 %v4744_v30, %v1300_v63  ;;  %v2212_v3 = vmax.f32 %v1298_v29, 0.0 }
 0x142   :  { %v2215_v2 = vmax.f32 %v1309_v60, 0.0  ;;  %3838 = vmatmul.mubr.bf16.gmra.mrb[144].mxu0 %v4388_v57 }
 0x143   :  { %v2213_v4 = vmax.f32 %v1301_v0, 0.0  ;;  %3841 = vmatprep.mubr.bf16.mxu0 %v4391_v59  ;;  %v4402_v59 = vld [vmem:[%s5481_s0 + $0x288] sm:$0xff]   ;;  %v4403_v0 = vld [vmem:[%s5481_s0 + $0x290] sm:$0xff]  }
 0x144   :  { %v4880_v5 = vpack.c.bf16 %v2215_v2, %v2214_v1 }
 0x145   :  { %v4882_v6 = vpack.c.bf16 %v2213_v4, %v2212_v3  ;;  %v3735_v46 = vpop.f32.mrb[40].mxu0 }
 0x146   :  { %v1322_v7 = vadd.f32 %v3735_v46, %v4744_v30  ;;  %v1313_v8 = vpop.f32.mrb[41].mxu0 }
 0x147   :  { %v1314_v10 = vadd.f32 %v4744_v30, %v1313_v8  ;;  %v3736_v45 = vpop.f32.mrb[42].mxu0 }
 0x148   :  { %v1325_v12 = vadd.f32 %v3736_v45, %v4744_v30  ;;  %v1316_v15 = vpop.f32.mrb[43].mxu0  ;;  %v2218_v17 = vmax.f32 %v1322_v7, 0.0 }
 0x149   :  { %v1317_v16 = vadd.f32 %v4744_v30, %v1316_v15  ;;  %v2216_v19 = vmax.f32 %v1314_v10, 0.0 }
 0x14a   :  { %v2219_v18 = vmax.f32 %v1325_v12, 0.0  ;;  %3842 = vmatmul.mubr.bf16.gmra.mrb[148].mxu0 %v4392_v9 }
 0x14b   :  { %v2217_v20 = vmax.f32 %v1317_v16, 0.0  ;;  %3845 = vmatprep.mubr.bf16.mxu0 %v4395_v11 }
 0x14c   :  { %v4894_v21 = vpack.c.bf16 %v2219_v18, %v2218_v17  ;;  %v4405_v17 = vld [vmem:[%s5481_s0 + $0x2a0] sm:$0xff]  }
 0x14d   :  { %v4896_v22 = vpack.c.bf16 %v2217_v20, %v2216_v19  ;;  %v3739_v62 = vpop.f32.mrb[44].mxu0 }
 0x14e   :  { %v1338_v23 = vadd.f32 %v3739_v62, %v4744_v30  ;;  %v1329_v24 = vpop.f32.mrb[45].mxu0 }
 0x14f   :  { %v1330_v26 = vadd.f32 %v4744_v30, %v1329_v24  ;;  %v3740_v61 = vpop.f32.mrb[46].mxu0 }
 0x150   :  { %v1341_v28 = vadd.f32 %v3740_v61, %v4744_v30  ;;  %v1332_v32 = vpop.f32.mrb[47].mxu0  ;;  %v2222_v34 = vmax.f32 %v1338_v23, 0.0 }
 0x151   :  { %v1333_v33 = vadd.f32 %v4744_v30, %v1332_v32  ;;  %v2220_v36 = vmax.f32 %v1330_v26, 0.0 }
 0x152   :  { %v2223_v35 = vmax.f32 %v1341_v28, 0.0  ;;  %3846 = vmatmul.mubr.bf16.gmra.mrb[152].mxu0 %v4396_v25 }
 0x153   :  { %v2221_v37 = vmax.f32 %v1333_v33, 0.0  ;;  %3849 = vmatprep.mubr.bf16.mxu0 %v4399_v27 }
 0x154   :  { %v4908_v38 = vpack.c.bf16 %v2223_v35, %v2222_v34  ;;  %v4407_v34 = vld [vmem:[%s5481_s0 + $0x2b0] sm:$0xff]  }
 0x155   :  { %v4910_v39 = vpack.c.bf16 %v2221_v37, %v2220_v36  ;;  %v3743_v14 = vpop.f32.mrb[48].mxu0 }
 0x156   :  { %v1354_v40 = vadd.f32 %v3743_v14, %v4744_v30  ;;  %v1345_v41 = vpop.f32.mrb[49].mxu0 }
 0x157   :  { %v1346_v43 = vadd.f32 %v4744_v30, %v1345_v41  ;;  %v3744_v13 = vpop.f32.mrb[50].mxu0 }
 0x158   :  { %v1357_v47 = vadd.f32 %v3744_v13, %v4744_v30  ;;  %v1348_v48 = vpop.f32.mrb[51].mxu0  ;;  %v2226_v50 = vmax.f32 %v1354_v40, 0.0 }
 0x159   :  { %v1349_v49 = vadd.f32 %v4744_v30, %v1348_v48  ;;  %v2224_v31 = vmax.f32 %v1346_v43, 0.0 }
 0x15a   :  { %v2227_v52 = vmax.f32 %v1357_v47, 0.0  ;;  %3850 = vmatmul.mubr.bf16.gmra.mrb[156].mxu0 %v4400_v42 }
 0x15b   :  { %v2225_v54 = vmax.f32 %v1349_v49, 0.0  ;;  %3853 = vmatprep.mubr.bf16.mxu0 %v4401_v44 }
 0x15c   :  { %v4020_v55 = vpack.c.bf16 %v2227_v52, %v2226_v50  ;;  %v4409_v50 = vld [vmem:[%s5481_s0 + $0x2c0] sm:$0xff]  }
 0x15d   :  { %v4016_v56 = vpack.c.bf16 %v2225_v54, %v2224_v31  ;;  %v3747_v57 = vpop.f32.mrb[52].mxu0 }
 0x15e   :  { %v1370_v29 = vadd.f32 %v3747_v57, %v4744_v30  ;;  %v1361_v58 = vpop.f32.mrb[53].mxu0 }
 0x15f   :  { %v1362_v60 = vadd.f32 %v4744_v30, %v1361_v58  ;;  %v3748_v63 = vpop.f32.mrb[54].mxu0  ;;  %4017 = vmatprep.subr.bf16.mxu1 %v4016_v56  ;;  %v2434_v58 = vld [vmem:[%s5482_s1 + $0x10] sm:$0xff] }
 0x160   :  { %v1373_v1 = vadd.f32 %v3748_v63, %v4744_v30  ;;  %v1364_v2 = vpop.f32.mrb[55].mxu0  ;;  %4019 = vmatpush3.bf16.msra.mxu1 %v4865_v53  ;;  %v2230_v4 = vmax.f32 %v1370_v29, 0.0  ;;  %v4404_v53 = vld [vmem:[%s5481_s0 + $0x298] sm:$0xff]  }
 0x161   :  { %v1365_v3 = vadd.f32 %v4744_v30, %v1364_v2  ;;  %4021 = vmatprep.subr.bf16.mxu1 %v4020_v55  ;;  %v2228_v7 = vmax.f32 %v1362_v60, 0.0  ;;  %v2437_v60 = vld [vmem:[%s5482_s1 + $0x28] sm:$0xff] }
 0x162   :  { %v2231_v46 = vmax.f32 %v1373_v1, 0.0  ;;  %3854 = vmatmul.mubr.bf16.gmra.mrb[160].mxu0 %v4402_v59  ;;  %v4410_v1 = vld [vmem:[%s5481_s0 + $0x2c8] sm:$0xff]  }
 0x163   :  { %v2229_v8 = vmax.f32 %v1365_v3, 0.0  ;;  %3857 = vmatprep.mubr.bf16.mxu0 %v4403_v0  ;;  %v4411_v3 = vld [vmem:[%s5481_s0 + $0x2d0] sm:$0xff]  }
 0x164   :  { %v4028_v9 = vpack.c.bf16 %v2231_v46, %v2230_v4  ;;  %4023 = vmatpush3.bf16.msra.mxu1 %v4859_v51 }
 0x165   :  { %v4024_v10 = vpack.c.bf16 %v2229_v8, %v2228_v7  ;;  %v3751_v45 = vpop.f32.mrb[56].mxu0 }
 0x166   :  { %v1386_v11 = vadd.f32 %v3751_v45, %v4744_v30  ;;  %v1377_v12 = vpop.f32.mrb[57].mxu0 }
 0x167   :  { %v1378_v15 = vadd.f32 %v4744_v30, %v1377_v12  ;;  %v3752_v16 = vpop.f32.mrb[58].mxu0  ;;  %4025 = vmatprep.subr.bf16.mxu1 %v4024_v10 }
 0x168   :  { %v1389_v18 = vadd.f32 %v3752_v16, %v4744_v30  ;;  %v1380_v51 = vpop.f32.mrb[59].mxu0  ;;  %4027 = vmatpush3.bf16.msra.mxu1 %v4882_v6  ;;  %v2234_v20 = vmax.f32 %v1386_v11, 0.0  ;;  %v4406_v6 = vld [vmem:[%s5481_s0 + $0x2a8] sm:$0xff]  }
 0x169   :  { %v1381_v19 = vadd.f32 %v4744_v30, %v1380_v51  ;;  %4029 = vmatprep.subr.bf16.mxu1 %v4028_v9  ;;  %v2232_v23 = vmax.f32 %v1378_v15, 0.0 }
 0x16a   :  { %v2235_v62 = vmax.f32 %v1389_v18, 0.0  ;;  %3858 = vmatmul.mubr.bf16.gmra.mrb[164].mxu0 %v4404_v53 }
 0x16b   :  { %v2233_v24 = vmax.f32 %v1381_v19, 0.0  ;;  %3861 = vmatprep.mubr.bf16.mxu0 %v4405_v17  ;;  %v4412_v17 = vld [vmem:[%s5481_s0 + $0x2d8] sm:$0xff]   ;;  %v4413_v19 = vld [vmem:[%s5481_s0 + $0x2e0] sm:$0xff]  }
 0x16c   :  { %v4036_v25 = vpack.c.bf16 %v2235_v62, %v2234_v20  ;;  %4031 = vmatpush3.bf16.msra.mxu1 %v4880_v5 }
 0x16d   :  { %v4032_v26 = vpack.c.bf16 %v2233_v24, %v2232_v23  ;;  %v3755_v61 = vpop.f32.mrb[60].mxu0 }
 0x16e   :  { %v1402_v27 = vadd.f32 %v3755_v61, %v4744_v30  ;;  %v1393_v28 = vpop.f32.mrb[61].mxu0 }
 0x16f   :  { %v1394_v32 = vadd.f32 %v4744_v30, %v1393_v28  ;;  %v3756_v33 = vpop.f32.mrb[62].mxu0  ;;  %4033 = vmatprep.subr.bf16.mxu1 %v4032_v26 }
 0x170   :  { %v1405_v35 = vadd.f32 %v3756_v33, %v4744_v30  ;;  %v1396_v5 = vpop.f32.mrb[63].mxu0  ;;  %4035 = vmatpush3.bf16.msra.mxu1 %v4896_v22  ;;  %v2238_v37 = vmax.f32 %v1402_v27, 0.0  ;;  %v4408_v22 = vld [vmem:[%s5481_s0 + $0x2b8] sm:$0xff]  }
 0x171   :  { %v1397_v36 = vadd.f32 %v4744_v30, %v1396_v5  ;;  %4037 = vmatprep.subr.bf16.mxu1 %v4036_v25  ;;  %v2236_v40 = vmax.f32 %v1394_v32, 0.0 }
 0x172   :  { %v2239_v14 = vmax.f32 %v1405_v35, 0.0  ;;  %3862 = vmatmul.mubr.bf16.gmra.mrb[168].mxu0 %v4406_v6 }
 0x173   :  { %v2237_v41 = vmax.f32 %v1397_v36, 0.0  ;;  %3865 = vmatprep.mubr.bf16.mxu0 %v4407_v34  ;;  %v4414_v34 = vld [vmem:[%s5481_s0 + $0x2e8] sm:$0xff]   ;;  %v4415_v36 = vld [vmem:[%s5481_s0 + $0x2f0] sm:$0xff]  }
 0x174   :  { %v4044_v42 = vpack.c.bf16 %v2239_v14, %v2238_v37  ;;  %4039 = vmatpush3.bf16.msra.mxu1 %v4894_v21 }
 0x175   :  { %v4040_v43 = vpack.c.bf16 %v2237_v41, %v2236_v40  ;;  %v3759_v13 = vpop.f32.mrb[64].mxu0 }
 0x176   :  { %v1418_v44 = vadd.f32 %v3759_v13, %v4744_v30  ;;  %v1409_v47 = vpop.f32.mrb[65].mxu0 }
 0x177   :  { %v1410_v48 = vadd.f32 %v4744_v30, %v1409_v47  ;;  %v3760_v49 = vpop.f32.mrb[66].mxu0  ;;  %4041 = vmatprep.subr.bf16.mxu1 %v4040_v43 }
 0x178   :  { %v1421_v52 = vadd.f32 %v3760_v49, %v4744_v30  ;;  %v1412_v21 = vpop.f32.mrb[67].mxu0  ;;  %4043 = vmatpush3.bf16.msra.mxu1 %v4910_v39  ;;  %v2242_v54 = vmax.f32 %v1418_v44, 0.0 }
 0x179   :  { %v1413_v31 = vadd.f32 %v4744_v30, %v1412_v21  ;;  %4045 = vmatprep.subr.bf16.mxu1 %v4044_v42  ;;  %v2240_v56 = vmax.f32 %v1410_v48, 0.0 }
 0x17a   :  { %v2243_v55 = vmax.f32 %v1421_v52, 0.0  ;;  %3866 = vmatmul.mubr.bf16.gmra.mrb[172].mxu0 %v4408_v22 }
 0x17b   :  { %v2241_v57 = vmax.f32 %v1413_v31, 0.0  ;;  %3869 = vmatprep.mubr.bf16.mxu0 %v4409_v50  ;;  %v4416_v50 = vld [vmem:[%s5481_s0 + $0x2f8] sm:$0xff]   ;;  %v4417_v31 = vld [vmem:[%s5481_s0 + $0x300] sm:$0xff]  }
 0x17c   :  { %v4969_v29 = vpack.c.bf16 %v2243_v55, %v2242_v54  ;;  %4047 = vmatpush3.bf16.msra.mxu1 %v4908_v38 }
 0x17d   :  { %v4975_v59 = vpack.c.bf16 %v2241_v57, %v2240_v56  ;;  %v3763_v39 = vpop.f32.mrb[68].mxu0 }
 0x17e   :  { %v1434_v63 = vadd.f32 %v3763_v39, %v4744_v30  ;;  %v1425_v0 = vpop.f32.mrb[69].mxu0 }
 0x17f   :  { %v1426_v38 = vadd.f32 %v4744_v30, %v1425_v0  ;;  %v3764_v2 = vpop.f32.mrb[70].mxu0  ;;  %2583 = vmatmul.mubr.f32.vlgmr.msra.gmra.mrb[62].mxu1 %v2434_v58 }
 0x180   :  { %v1437_v4 = vadd.f32 %v3764_v2, %v4744_v30  ;;  %v1428_v46 = vpop.f32.mrb[71].mxu0  ;;  %2652 = vmatprep.mubr.f32.mxu1 %v2437_v60  ;;  %v2246_v8 = vmax.f32 %v1434_v63, 0.0 }
 0x181   :  { %v1429_v7 = vadd.f32 %v4744_v30, %v1428_v46  ;;  %v2244_v10 = vmax.f32 %v1426_v38, 0.0 }
 0x182   :  { %v2247_v9 = vmax.f32 %v1437_v4, 0.0  ;;  %3870 = vmatmul.mubr.bf16.gmra.mrb[176].mxu0 %v4410_v1 }
 0x183   :  { %v2245_v45 = vmax.f32 %v1429_v7, 0.0  ;;  %3873 = vmatprep.mubr.bf16.mxu0 %v4411_v3  ;;  %v4418_v3 = vld [vmem:[%s5481_s0 + $0x308] sm:$0xff]  }
 0x184   :  { %v4990_v11 = vpack.c.bf16 %v2247_v9, %v2246_v8 }
 0x185   :  { %v4992_v12 = vpack.c.bf16 %v2245_v45, %v2244_v10  ;;  %v3767_v53 = vpop.f32.mrb[72].mxu0 }
 0x186   :  { %v1450_v15 = vadd.f32 %v3767_v53, %v4744_v30  ;;  %v1441_v16 = vpop.f32.mrb[73].mxu0 }
 0x187   :  { %v1442_v18 = vadd.f32 %v4744_v30, %v1441_v16  ;;  %v3768_v51 = vpop.f32.mrb[74].mxu0 }
 0x188   :  { %v1453_v20 = vadd.f32 %v3768_v51, %v4744_v30  ;;  %v1444_v62 = vpop.f32.mrb[75].mxu0  ;;  %v2250_v24 = vmax.f32 %v1450_v15, 0.0 }
 0x189   :  { %v1445_v23 = vadd.f32 %v4744_v30, %v1444_v62  ;;  %v2248_v26 = vmax.f32 %v1442_v18, 0.0 }
 0x18a   :  { %v2251_v25 = vmax.f32 %v1453_v20, 0.0  ;;  %3874 = vmatmul.mubr.bf16.gmra.mrb[180].mxu0 %v4412_v17 }
 0x18b   :  { %v2249_v61 = vmax.f32 %v1445_v23, 0.0  ;;  %3877 = vmatprep.mubr.bf16.mxu0 %v4413_v19 }
 0x18c   :  { %v5004_v27 = vpack.c.bf16 %v2251_v25, %v2250_v24 }
 0x18d   :  { %v5006_v28 = vpack.c.bf16 %v2249_v61, %v2248_v26  ;;  %v3771_v6 = vpop.f32.mrb[76].mxu0 }
 0x18e   :  { %v1466_v32 = vadd.f32 %v3771_v6, %v4744_v30  ;;  %v1457_v33 = vpop.f32.mrb[77].mxu0 }
 0x18f   :  { %v1458_v35 = vadd.f32 %v4744_v30, %v1457_v33  ;;  %v3772_v5 = vpop.f32.mrb[78].mxu0 }
 0x190   :  { %v1469_v37 = vadd.f32 %v3772_v5, %v4744_v30  ;;  %v1460_v14 = vpop.f32.mrb[79].mxu0  ;;  %v2254_v41 = vmax.f32 %v1466_v32, 0.0 }
 0x191   :  { %v1461_v40 = vadd.f32 %v4744_v30, %v1460_v14  ;;  %v2252_v43 = vmax.f32 %v1458_v35, 0.0 }
 0x192   :  { %v2255_v42 = vmax.f32 %v1469_v37, 0.0  ;;  %3878 = vmatmul.mubr.bf16.gmra.mrb[184].mxu0 %v4414_v34 }
 0x193   :  { %v2253_v13 = vmax.f32 %v1461_v40, 0.0  ;;  %3881 = vmatprep.mubr.bf16.mxu0 %v4415_v36 }
 0x194   :  { %v5018_v44 = vpack.c.bf16 %v2255_v42, %v2254_v41 }
 0x195   :  { %v5020_v47 = vpack.c.bf16 %v2253_v13, %v2252_v43  ;;  %v3775_v22 = vpop.f32.mrb[80].mxu0 }
 0x196   :  { %v1482_v48 = vadd.f32 %v3775_v22, %v4744_v30  ;;  %v1473_v49 = vpop.f32.mrb[81].mxu0 }
 0x197   :  { %v1474_v52 = vadd.f32 %v4744_v30, %v1473_v49  ;;  %v3776_v21 = vpop.f32.mrb[82].mxu0 }
 0x198   :  { %v1485_v54 = vadd.f32 %v3776_v21, %v4744_v30  ;;  %v1476_v55 = vpop.f32.mrb[83].mxu0  ;;  %v2258_v57 = vmax.f32 %v1482_v48, 0.0 }
 0x199   :  { %v1477_v56 = vadd.f32 %v4744_v30, %v1476_v55  ;;  %v2256_v39 = vmax.f32 %v1474_v52, 0.0 }
 0x19a   :  { %v2259_v58 = vmax.f32 %v1485_v54, 0.0  ;;  %3882 = vmatmul.mubr.bf16.gmra.mrb[188].mxu0 %v4416_v50 }
 0x19b   :  { %v2257_v60 = vmax.f32 %v1477_v56, 0.0  ;;  %3885 = vmatprep.mubr.bf16.mxu0 %v4417_v31  ;;  %v3891_v31 = vpop.f32.mrb[0].mxu1 }
 0x19c   :  { %v4052_v63 = vpack.c.bf16 %v2259_v58, %v2258_v57  ;;  %v1937_v55 = vpop.f32.mrb[1].mxu1 }
 0x19d   :  { %v4048_v0 = vpack.c.bf16 %v2257_v60, %v2256_v39  ;;  %v3779_v1 = vpop.f32.mrb[84].mxu0  ;;  %v3892_v57 = vpop.f32.mrb[2].mxu1 }
 0x19e   :  { %v1498_v38 = vadd.f32 %v3779_v1, %v4744_v30  ;;  %v1489_v2 = vpop.f32.mrb[85].mxu0  ;;  %v1940_v60 = vpop.f32.mrb[3].mxu1  ;;  %v1938_v1 = vadd.f32 %v4744_v30, %v1937_v55 }
 0x19f   :  { %v1490_v4 = vadd.f32 %v4744_v30, %v1489_v2  ;;  %v3780_v46 = vpop.f32.mrb[86].mxu0  ;;  %4049 = vmatprep.subr.bf16.mxu1 %v4048_v0  ;;  %v2436_v0 = vld [vmem:[%s5482_s1 + $0x20] sm:$0xff] }
 0x1a0   :  { %v1501_v7 = vadd.f32 %v3780_v46, %v4744_v30  ;;  %v1492_v8 = vpop.f32.mrb[87].mxu0  ;;  %4051 = vmatpush3.bf16.msra.mxu1 %v4975_v59  ;;  %v2262_v10 = vmax.f32 %v1498_v38, 0.0  ;;  %v1949_v38 = vadd.f32 %v3892_v57, %v4744_v30  ;;  %v1941_v46 = vadd.f32 %v4744_v30, %v1940_v60 }
 0x1a1   :  { %v1493_v9 = vadd.f32 %v4744_v30, %v1492_v8  ;;  %4053 = vmatprep.subr.bf16.mxu1 %v4052_v63  ;;  %v2260_v53 = vmax.f32 %v1490_v4, 0.0  ;;  %v2439_v4 = vld [vmem:[%s5482_s1 + $0x38] sm:$0xff] }
 0x1a2   :  { %v2263_v45 = vmax.f32 %v1501_v7, 0.0  ;;  %3886 = vmatmul.mubr.bf16.gmra.mrb[192].mxu0 %v4418_v3 }
 0x1a3   :  { %v2261_v15 = vmax.f32 %v1493_v9, 0.0  ;;  %v2372_v9 = vmax.f32 %v1938_v1, 0.0 }
 0x1a4   :  { %v4060_v16 = vpack.c.bf16 %v2263_v45, %v2262_v10  ;;  %4055 = vmatpush3.bf16.msra.mxu1 %v4969_v29  ;;  %v2375_v10 = vmax.f32 %v1949_v38, 0.0 }
 0x1a5   :  { %v4056_v17 = vpack.c.bf16 %v2261_v15, %v2260_v53  ;;  %v3783_v18 = vpop.f32.mrb[88].mxu0  ;;  %v2373_v15 = vmax.f32 %v1941_v46, 0.0 }
 0x1a6   :  { %v1514_v51 = vadd.f32 %v3783_v18, %v4744_v30  ;;  %v1505_v19 = vpop.f32.mrb[89].mxu0 }
 0x1a7   :  { %v1506_v20 = vadd.f32 %v4744_v30, %v1505_v19  ;;  %v3784_v62 = vpop.f32.mrb[90].mxu0  ;;  %4057 = vmatprep.subr.bf16.mxu1 %v4056_v17  ;;  %v3895_v19 = vpop.f32.mrb[4].mxu1 }
 0x1a8   :  { %v1517_v59 = vadd.f32 %v3784_v62, %v4744_v30  ;;  %v1508_v23 = vpop.f32.mrb[91].mxu0  ;;  %4059 = vmatpush3.bf16.msra.mxu1 %v4992_v12  ;;  %v2266_v25 = vmax.f32 %v1514_v51, 0.0  ;;  %v5084_v62 = vpack.c.bf16 %v2373_v15, %v2372_v9 }
 0x1a9   :  { %v1509_v24 = vadd.f32 %v4744_v30, %v1508_v23  ;;  %4061 = vmatprep.subr.bf16.mxu1 %v4060_v16  ;;  %v2264_v29 = vmax.f32 %v1506_v20, 0.0  ;;  %v5078_v16 = vld [vmem:[%s5483_s3] ss:$0 sm:$0xff] }
 0x1aa   :  { %v2267_v26 = vmax.f32 %v1517_v59, 0.0 }
 0x1ab   :  { %v2265_v61 = vmax.f32 %v1509_v24, 0.0 }
 0x1ac   :  { %v4068_v6 = vpack.c.bf16 %v2267_v26, %v2266_v25  ;;  %4063 = vmatpush3.bf16.msra.mxu1 %v4990_v11 }
 0x1ad   :  { %v4064_v32 = vpack.c.bf16 %v2265_v61, %v2264_v29  ;;  %v3787_v33 = vpop.f32.mrb[92].mxu0 }
 0x1ae   :  { %v1530_v34 = vadd.f32 %v3787_v33, %v4744_v30  ;;  %v1521_v35 = vpop.f32.mrb[93].mxu0 }
 0x1af   :  { %v1522_v5 = vadd.f32 %v4744_v30, %v1521_v35  ;;  %v3788_v36 = vpop.f32.mrb[94].mxu0  ;;  %4065 = vmatprep.subr.bf16.mxu1 %v4064_v32 }
 0x1b0   :  { %v1533_v12 = vadd.f32 %v3788_v36, %v4744_v30  ;;  %v1524_v37 = vpop.f32.mrb[95].mxu0  ;;  %4067 = vmatpush3.bf16.msra.mxu1 %v5006_v28  ;;  %v2270_v40 = vmax.f32 %v1530_v34, 0.0 }
 0x1b1   :  { %v1525_v14 = vadd.f32 %v4744_v30, %v1524_v37  ;;  %4069 = vmatprep.subr.bf16.mxu1 %v4068_v6  ;;  %v2268_v11 = vmax.f32 %v1522_v5, 0.0  ;;  %v1962_v6 = vadd.f32 %v5078_v16, %v3895_v19 }
 0x1b2   :  { %v2271_v41 = vmax.f32 %v1533_v12, 0.0 }
 0x1b3   :  { %v2269_v42 = vmax.f32 %v1525_v14, 0.0  ;;  %v2378_v37 = vmax.f32 %v1962_v6, 0.0 }
 0x1b4   :  { %v4076_v43 = vpack.c.bf16 %v2271_v41, %v2270_v40  ;;  %4071 = vmatpush3.bf16.msra.mxu1 %v5004_v27 }
 0x1b5   :  { %v4072_v13 = vpack.c.bf16 %v2269_v42, %v2268_v11  ;;  %v3791_v22 = vpop.f32.mrb[96].mxu0 }
 0x1b6   :  { %v1546_v48 = vadd.f32 %v3791_v22, %v4744_v30  ;;  %v1537_v49 = vpop.f32.mrb[97].mxu0 }
 0x1b7   :  { %v1538_v50 = vadd.f32 %v4744_v30, %v1537_v49  ;;  %v3792_v52 = vpop.f32.mrb[98].mxu0  ;;  %4073 = vmatprep.subr.bf16.mxu1 %v4072_v13 }
 0x1b8   :  { %v1549_v28 = vadd.f32 %v3792_v52, %v4744_v30  ;;  %v1540_v21 = vpop.f32.mrb[99].mxu0  ;;  %4075 = vmatpush3.bf16.msra.mxu1 %v5020_v47  ;;  %v2274_v27 = vmax.f32 %v1546_v48, 0.0  ;;  %v1946_v47 = vadd.f32 %v3891_v31, %v4744_v30 }
 0x1b9   :  { %v1541_v54 = vadd.f32 %v4744_v30, %v1540_v21  ;;  %4077 = vmatprep.subr.bf16.mxu1 %v4076_v43  ;;  %v2272_v58 = vmax.f32 %v1538_v50, 0.0 }
 0x1ba   :  { %v2275_v56 = vmax.f32 %v1549_v28, 0.0  ;;  %v2374_v8 = vmax.f32 %v1946_v47, 0.0 }
 0x1bb   :  { %v2273_v39 = vmax.f32 %v1541_v54, 0.0 }
 0x1bc   :  { %v5058_v63 = vpack.c.bf16 %v2275_v56, %v2274_v27  ;;  %4079 = vmatpush3.bf16.msra.mxu1 %v5018_v44  ;;  %v5081_v51 = vpack.c.bf16 %v2375_v10, %v2374_v8 }
 0x1bd   :  { %v5067_v2 = vpack.c.bf16 %v2273_v39, %v2272_v58  ;;  %v3795_v3 = vpop.f32.mrb[100].mxu0 }
 0x1be   :  { %v1562_v44 = vadd.f32 %v3795_v3, %v4744_v30  ;;  %v1553_v7 = vpop.f32.mrb[101].mxu0 }
 0x1bf   :  { %v1554_v45 = vadd.f32 %v4744_v30, %v1553_v7  ;;  %v3796_v53 = vpop.f32.mrb[102].mxu0  ;;  %2653 = vmatmul.mubr.f32.vlgmr.msra.gmra.mrb[64].mxu1 %v2436_v0  ;;  %v1953_v30 = vpop.f32.mrb[5].mxu1 }
 0x1c0   :  { %v1565_v17 = vadd.f32 %v5078_v16, %v3796_v53  ;;  %v1556_v18 = vpop.f32.mrb[103].mxu0  ;;  %2722 = vmatprep.mubr.f32.mxu1 %v2439_v4  ;;  %v2278_v59 = vmax.f32 %v1562_v44, 0.0  ;;  %v3896_v24 = vpop.f32.mrb[6].mxu1  ;;  %v1954_v32 = vadd.f32 %v5078_v16, %v1953_v30 }
 0x1c1   :  { %v1557_v20 = vadd.f32 %v5078_v16, %v1556_v18  ;;  %v2276_v25 = vmax.f32 %v1554_v45, 0.0  ;;  %v1956_v29 = vpop.f32.mrb[7].mxu1  ;;  %v1965_v33 = vadd.f32 %v5078_v16, %v3896_v24 }
 0x1c2   :  { %v2279_v23 = vmax.f32 %v1565_v17, 0.0  ;;  %v1957_v5 = vadd.f32 %v5078_v16, %v1956_v29  ;;  %v2376_v14 = vmax.f32 %v1954_v32, 0.0  ;;  %v3899_v48 = vpop.f32.mrb[8].mxu1 }
 0x1c3   :  { %v2277_v26 = vmax.f32 %v1557_v20, 0.0  ;;  %v2379_v40 = vmax.f32 %v1965_v33, 0.0  ;;  %v1969_v52 = vpop.f32.mrb[9].mxu1  ;;  %v1978_v57 = vadd.f32 %v5078_v16, %v3899_v48 }
 0x1c4   :  { %v5086_v61 = vpack.c.bf16 %v2279_v23, %v2278_v59  ;;  %v2377_v42 = vmax.f32 %v1957_v5, 0.0  ;;  %v3900_v31 = vpop.f32.mrb[10].mxu1  ;;  %v1970_v58 = vadd.f32 %v5078_v16, %v1969_v52 }
 0x1c5   :  { %v5091_v34 = vpack.c.bf16 %v2277_v26, %v2276_v25  ;;  %v3799_v35 = vpop.f32.mrb[104].mxu0  ;;  %v5097_v22 = vpack.c.bf16 %v2379_v40, %v2378_v37  ;;  %v1972_v27 = vpop.f32.mrb[11].mxu1  ;;  %v1981_v39 = vadd.f32 %v5078_v16, %v3900_v31  ;;  %v2382_v3 = vmax.f32 %v1978_v57, 0.0 }
 0x1c6   :  { %v1578_v36 = vadd.f32 %v5078_v16, %v3799_v35  ;;  %v1569_v12 = vpop.f32.mrb[105].mxu0  ;;  %v5100_v50 = vpack.c.bf16 %v2377_v42, %v2376_v14  ;;  %v1973_v47 = vadd.f32 %v5078_v16, %v1972_v27  ;;  %v2380_v4 = vmax.f32 %v1970_v58, 0.0  ;;  %v3903_v53 = vpop.f32.mrb[12].mxu1 }
 0x1c7   :  { %v1570_v41 = vadd.f32 %v5078_v16, %v1569_v12  ;;  %v3800_v11 = vpop.f32.mrb[106].mxu0  ;;  %v2383_v46 = vmax.f32 %v1981_v39, 0.0  ;;  %v1985_v18 = vpop.f32.mrb[13].mxu1  ;;  %v1994_v26 = vadd.f32 %v5078_v16, %v3903_v53 }
 0x1c8   :  { %v1581_v43 = vadd.f32 %v5078_v16, %v3800_v11  ;;  %v1572_v13 = vpop.f32.mrb[107].mxu0  ;;  %v2282_v28 = vmax.f32 %v1578_v36, 0.0  ;;  %v2381_v8 = vmax.f32 %v1973_v47, 0.0  ;;  %v3904_v30 = vpop.f32.mrb[14].mxu1  ;;  %v1986_v29 = vadd.f32 %v5078_v16, %v1985_v18 }
 0x1c9   :  { %v1573_v49 = vadd.f32 %v5078_v16, %v1572_v13  ;;  %v2280_v54 = vmax.f32 %v1570_v41, 0.0  ;;  %v5113_v45 = vpack.c.bf16 %v2383_v46, %v2382_v3  ;;  %v1988_v24 = vpop.f32.mrb[15].mxu1  ;;  %v1997_v6 = vadd.f32 %v5078_v16, %v3904_v30 }
 0x1ca   :  { %v2283_v21 = vmax.f32 %v1581_v43, 0.0  ;;  %v5116_v17 = vpack.c.bf16 %v2381_v8, %v2380_v4  ;;  %v1989_v35 = vadd.f32 %v5078_v16, %v1988_v24  ;;  %v2386_v12 = vmax.f32 %v1994_v26, 0.0  ;;  %v3907_v48 = vpop.f32.mrb[16].mxu1 }
 0x1cb   :  { %v2281_v55 = vmax.f32 %v1573_v49, 0.0  ;;  %v2384_v37 = vmax.f32 %v1986_v29, 0.0  ;;  %v2387_v14 = vmax.f32 %v1997_v6, 0.0  ;;  %v2010_v39 = vadd.f32 %v5078_v16, %v3907_v48 }
 0x1cc   :  { %v5102_v56 = vpack.c.bf16 %v2283_v21, %v2282_v28  ;;  %v2385_v11 = vmax.f32 %v1989_v35, 0.0  ;;  %v2001_v28 = vpop.f32.mrb[17].mxu1 }
 0x1cd   :  { %v5107_v60 = vpack.c.bf16 %v2281_v55, %v2280_v54  ;;  %v3803_v0 = vpop.f32.mrb[108].mxu0  ;;  %v5129_v13 = vpack.c.bf16 %v2387_v14, %v2386_v12  ;;  %v3908_v54 = vpop.f32.mrb[18].mxu1 }
 0x1ce   :  { %v1594_v1 = vadd.f32 %v5078_v16, %v3803_v0  ;;  %v1585_v38 = vpop.f32.mrb[109].mxu0  ;;  %v5132_v52 = vpack.c.bf16 %v2385_v11, %v2384_v37  ;;  %v2004_v57 = vpop.f32.mrb[19].mxu1  ;;  %v2002_v0 = vadd.f32 %v5078_v16, %v2001_v28  ;;  %v2013_v47 = vadd.f32 %v5078_v16, %v3908_v54 }
 0x1cf   :  { %v1586_v44 = vadd.f32 %v5078_v16, %v1585_v38  ;;  %v3804_v7 = vpop.f32.mrb[110].mxu0  ;;  %v2005_v3 = vadd.f32 %v5078_v16, %v2004_v57 }
 0x1d0   :  { %v1597_v9 = vadd.f32 %v5078_v16, %v3804_v7  ;;  %v1588_v10 = vpop.f32.mrb[111].mxu0  ;;  %v2286_v19 = vmax.f32 %v1594_v1, 0.0  ;;  %v2388_v7 = vmax.f32 %v2002_v0, 0.0  ;;  %v2391_v8 = vmax.f32 %v2013_v47, 0.0 }
 0x1d1   :  { %v1589_v15 = vadd.f32 %v5078_v16, %v1588_v10  ;;  %v2284_v59 = vmax.f32 %v1586_v44, 0.0  ;;  %v2390_v44 = vmax.f32 %v2010_v39, 0.0  ;;  %v2389_v53 = vmax.f32 %v2005_v3, 0.0 }
 0x1d2   :  { %v2287_v20 = vmax.f32 %v1597_v9, 0.0 }
 0x1d3   :  { %v2285_v23 = vmax.f32 %v1589_v15, 0.0 }
 0x1d4   :  { %v5118_v25 = vpack.c.bf16 %v2287_v20, %v2286_v19  ;;  %v5142_v19 = vpack.c.bf16 %v2391_v8, %v2390_v44  ;;  %v3911_v20 = vpop.f32.mrb[20].mxu1 }
 0x1d5   :  { %v5123_v32 = vpack.c.bf16 %v2285_v23, %v2284_v59  ;;  %v3807_v33 = vpop.f32.mrb[112].mxu0  ;;  %v5145_v59 = vpack.c.bf16 %v2389_v53, %v2388_v7  ;;  %v2017_v23 = vpop.f32.mrb[21].mxu1 }
 0x1d6   :  { %v1610_v5 = vadd.f32 %v5078_v16, %v3807_v33  ;;  %v1601_v36 = vpop.f32.mrb[113].mxu0  ;;  %v3912_v29 = vpop.f32.mrb[22].mxu1 }
 0x1d7   :  { %v1602_v40 = vadd.f32 %v5078_v16, %v1601_v36  ;;  %v3808_v41 = vpop.f32.mrb[114].mxu0  ;;  %v2020_v35 = vpop.f32.mrb[23].mxu1  ;;  %v2018_v36 = vadd.f32 %v5078_v16, %v2017_v23  ;;  %v2029_v12 = vadd.f32 %v5078_v16, %v3912_v29 }
 0x1d8   :  { %v1613_v42 = vadd.f32 %v5078_v16, %v3808_v41  ;;  %v1604_v43 = vpop.f32.mrb[115].mxu0  ;;  %v2290_v21 = vmax.f32 %v1610_v5, 0.0 }
 0x1d9   :  { %v1605_v49 = vadd.f32 %v5078_v16, %v1604_v43  ;;  %v2288_v55 = vmax.f32 %v1602_v40, 0.0  ;;  %v2021_v40 = vadd.f32 %v5078_v16, %v2020_v35  ;;  %v2392_v43 = vmax.f32 %v2018_v36, 0.0 }
 0x1da   :  { %v2291_v31 = vmax.f32 %v1613_v42, 0.0  ;;  %v2395_v48 = vmax.f32 %v2029_v12, 0.0 }
 0x1db   :  { %v2289_v27 = vmax.f32 %v1605_v49, 0.0 }
 0x1dc   :  { %v4084_v58 = vpack.c.bf16 %v2291_v31, %v2290_v21 }
 0x1dd   :  { %v4080_v1 = vpack.c.bf16 %v2289_v27, %v2288_v55  ;;  %v3811_v38 = vpop.f32.mrb[116].mxu0  ;;  %v3915_v55 = vpop.f32.mrb[24].mxu1 }
 0x1de   :  { %v1626_v4 = vadd.f32 %v5078_v16, %v3811_v38  ;;  %v1617_v46 = vpop.f32.mrb[117].mxu0 }
 0x1df   :  { %v1618_v9 = vadd.f32 %v5078_v16, %v1617_v46  ;;  %v3812_v10 = vpop.f32.mrb[118].mxu0  ;;  %4081 = vmatprep.subr.bf16.mxu1 %v4080_v1 }
 0x1e0   :  { %v1629_v15 = vadd.f32 %v5078_v16, %v3812_v10  ;;  %v1620_v18 = vpop.f32.mrb[119].mxu0  ;;  %4083 = vmatpush3.bf16.msra.mxu1 %v5067_v2  ;;  %v2294_v24 = vmax.f32 %v1626_v4, 0.0  ;;  %v2026_v2 = vadd.f32 %v5078_v16, %v3911_v20 }
 0x1e1   :  { %v1621_v30 = vadd.f32 %v5078_v16, %v1620_v18  ;;  %4085 = vmatprep.subr.bf16.mxu1 %v4084_v58  ;;  %v2292_v6 = vmax.f32 %v1618_v9, 0.0  ;;  %v2033_v58 = vpop.f32.mrb[25].mxu1 }
 0x1e2   :  { %v2295_v26 = vmax.f32 %v1629_v15, 0.0  ;;  %v2394_v42 = vmax.f32 %v2026_v2, 0.0  ;;  %v3916_v47 = vpop.f32.mrb[26].mxu1  ;;  %v2034_v46 = vadd.f32 %v5078_v16, %v2033_v58 }
 0x1e3   :  { %v2293_v33 = vmax.f32 %v1621_v30, 0.0  ;;  %v2036_v3 = vpop.f32.mrb[27].mxu1  ;;  %v2045_v44 = vadd.f32 %v5078_v16, %v3916_v47 }
 0x1e4   :  { %v4092_v5 = vpack.c.bf16 %v2295_v26, %v2294_v24  ;;  %4087 = vmatpush3.bf16.msra.mxu1 %v5058_v63  ;;  %v2393_v63 = vmax.f32 %v2021_v40, 0.0  ;;  %v5156_v54 = vpack.c.bf16 %v2395_v48, %v2394_v42  ;;  %v2037_v9 = vadd.f32 %v5078_v16, %v2036_v3 }
 0x1e5   :  { %v4088_v37 = vpack.c.bf16 %v2293_v33, %v2292_v6  ;;  %v3815_v14 = vpop.f32.mrb[120].mxu0  ;;  %v2396_v18 = vmax.f32 %v2034_v46, 0.0  ;;  %v2399_v20 = vmax.f32 %v2045_v44, 0.0  ;;  %v3919_v6 = vpop.f32.mrb[28].mxu1 }
 0x1e6   :  { %v1642_v41 = vadd.f32 %v5078_v16, %v3815_v14  ;;  %v1633_v11 = vpop.f32.mrb[121].mxu0  ;;  %v5159_v57 = vpack.c.bf16 %v2393_v63, %v2392_v43 }
 0x1e7   :  { %v1634_v49 = vadd.f32 %v5078_v16, %v1633_v11  ;;  %v3816_v28 = vpop.f32.mrb[122].mxu0  ;;  %4089 = vmatprep.subr.bf16.mxu1 %v4088_v37 }
 0x1e8   :  { %v1645_v21 = vadd.f32 %v5078_v16, %v3816_v28  ;;  %v1636_v31 = vpop.f32.mrb[123].mxu0  ;;  %4091 = vmatpush3.bf16.msra.mxu1 %v5091_v34  ;;  %v2298_v39 = vmax.f32 %v1642_v41, 0.0  ;;  %v2042_v34 = vadd.f32 %v5078_v16, %v3915_v55 }
 0x1e9   :  { %v1637_v27 = vadd.f32 %v5078_v16, %v1636_v31  ;;  %4093 = vmatprep.subr.bf16.mxu1 %v4092_v5  ;;  %v2296_v1 = vmax.f32 %v1634_v49, 0.0  ;;  %v2049_v5 = vpop.f32.mrb[29].mxu1 }
 0x1ea   :  { %v2299_v0 = vmax.f32 %v1645_v21, 0.0  ;;  %v2398_v15 = vmax.f32 %v2042_v34, 0.0  ;;  %v3920_v12 = vpop.f32.mrb[30].mxu1  ;;  %v2050_v11 = vadd.f32 %v5078_v16, %v2049_v5 }
 0x1eb   :  { %v2297_v38 = vmax.f32 %v1637_v27, 0.0  ;;  %v2052_v40 = vpop.f32.mrb[31].mxu1  ;;  %v2061_v42 = vadd.f32 %v5078_v16, %v3920_v12 }
 0x1ec   :  { %v4100_v4 = vpack.c.bf16 %v2299_v0, %v2298_v39  ;;  %4095 = vmatpush3.bf16.msra.mxu1 %v5086_v61  ;;  %v2397_v61 = vmax.f32 %v2037_v9, 0.0  ;;  %v5170_v29 = vpack.c.bf16 %v2399_v20, %v2398_v15  ;;  %v2053_v49 = vadd.f32 %v5078_v16, %v2052_v40 }
 0x1ed   :  { %v4096_v7 = vpack.c.bf16 %v2297_v38, %v2296_v1  ;;  %v3819_v8 = vpop.f32.mrb[124].mxu0  ;;  %v2400_v31 = vmax.f32 %v2050_v11, 0.0  ;;  %v2403_v55 = vmax.f32 %v2061_v42, 0.0  ;;  %v3923_v1 = vpop.f32.mrb[32].mxu1 }
 0x1ee   :  { %v1658_v10 = vadd.f32 %v5078_v16, %v3819_v8  ;;  %v1649_v53 = vpop.f32.mrb[125].mxu0  ;;  %v5173_v35 = vpack.c.bf16 %v2397_v61, %v2396_v18 }
 0x1ef   :  { %v1650_v30 = vadd.f32 %v5078_v16, %v1649_v53  ;;  %v3820_v23 = vpop.f32.mrb[126].mxu0  ;;  %4097 = vmatprep.subr.bf16.mxu1 %v4096_v7  ;;  %v2074_v53 = vadd.f32 %v5078_v16, %v3923_v1 }
 0x1f0   :  { %v1661_v24 = vadd.f32 %v5078_v16, %v3820_v23  ;;  %v1652_v26 = vpop.f32.mrb[127].mxu0  ;;  %4099 = vmatpush3.bf16.msra.mxu1 %v5107_v60  ;;  %v2302_v2 = vmax.f32 %v1658_v10, 0.0  ;;  %v2058_v60 = vadd.f32 %v5078_v16, %v3919_v6  ;;  %v2441_v23 = vld [vmem:[%s5482_s1 + $0x48] sm:$0xff] }
 0x1f1   :  { %v1653_v33 = vadd.f32 %v5078_v16, %v1652_v26  ;;  %4101 = vmatprep.subr.bf16.mxu1 %v4100_v4  ;;  %v2300_v37 = vmax.f32 %v1650_v30, 0.0  ;;  %v2065_v4 = vpop.f32.mrb[33].mxu1  ;;  %v2406_v26 = vmax.f32 %v2074_v53, 0.0 }
 0x1f2   :  { %v2303_v36 = vmax.f32 %v1661_v24, 0.0  ;;  %v2402_v21 = vmax.f32 %v2058_v60, 0.0  ;;  %v3924_v44 = vpop.f32.mrb[34].mxu1  ;;  %v2066_v15 = vadd.f32 %v5078_v16, %v2065_v4 }
 0x1f3   :  { %v2301_v14 = vmax.f32 %v1653_v33, 0.0  ;;  %v2068_v9 = vpop.f32.mrb[35].mxu1  ;;  %v2077_v18 = vadd.f32 %v5078_v16, %v3924_v44 }
 0x1f4   :  { %v4108_v41 = vpack.c.bf16 %v2303_v36, %v2302_v2  ;;  %4103 = vmatpush3.bf16.msra.mxu1 %v5102_v56  ;;  %v2401_v56 = vmax.f32 %v2053_v49, 0.0  ;;  %v5184_v47 = vpack.c.bf16 %v2403_v55, %v2402_v21  ;;  %v2069_v61 = vadd.f32 %v5078_v16, %v2068_v9  ;;  %v3927_v12 = vpop.f32.mrb[36].mxu1 }
 0x1f5   :  { %v4104_v43 = vpack.c.bf16 %v2301_v14, %v2300_v37  ;;  %v3823_v48 = vpop.f32.mrb[128].mxu0  ;;  %v2404_v6 = vmax.f32 %v2066_v15, 0.0  ;;  %v2407_v33 = vmax.f32 %v2077_v18, 0.0  ;;  %v2081_v60 = vpop.f32.mrb[37].mxu1 }
 0x1f6   :  { %v1674_v28 = vadd.f32 %v5078_v16, %v3823_v48  ;;  %v1665_v63 = vpop.f32.mrb[129].mxu0  ;;  %v5187_v3 = vpack.c.bf16 %v2401_v56, %v2400_v31  ;;  %v2405_v36 = vmax.f32 %v2069_v61, 0.0  ;;  %v3928_v48 = vpop.f32.mrb[38].mxu1 }
 0x1f7   :  { %v1666_v27 = vadd.f32 %v5078_v16, %v1665_v63  ;;  %v3824_v58 = vpop.f32.mrb[130].mxu0  ;;  %4105 = vmatprep.subr.bf16.mxu1 %v4104_v43  ;;  %v5207_v40 = vpack.c.bf16 %v2407_v33, %v2406_v26  ;;  %v2082_v43 = vadd.f32 %v5078_v16, %v2081_v60  ;;  %v2093_v21 = vadd.f32 %v5078_v16, %v3928_v48  ;;  %v2084_v31 = vpop.f32.mrb[39].mxu1 }
 0x1f8   :  { %v1677_v39 = vadd.f32 %v5078_v16, %v3824_v58  ;;  %v1668_v0 = vpop.f32.mrb[131].mxu0  ;;  %4107 = vmatpush3.bf16.msra.mxu1 %v5123_v32  ;;  %v2306_v34 = vmax.f32 %v1674_v28, 0.0  ;;  %v2438_v32 = vld [vmem:[%s5482_s1 + $0x30] sm:$0xff]  ;;  %v5211_v42 = vpack.c.bf16 %v2405_v36, %v2404_v6  ;;  %v2085_v56 = vadd.f32 %v5078_v16, %v2084_v31 }
 0x1f9   :  { %v1669_v38 = vadd.f32 %v5078_v16, %v1668_v0  ;;  %4109 = vmatprep.subr.bf16.mxu1 %v4108_v41  ;;  %v2304_v7 = vmax.f32 %v1666_v27, 0.0  ;;  %v2090_v41 = vadd.f32 %v5078_v16, %v3927_v12  ;;  %v2408_v58 = vmax.f32 %v2082_v43, 0.0 }
 0x1fa   :  { %v2307_v46 = vmax.f32 %v1677_v39, 0.0  ;;  %v2411_v0 = vmax.f32 %v2093_v21, 0.0  ;;  %v2409_v4 = vmax.f32 %v2085_v56, 0.0 }
 0x1fb   :  { %v2305_v8 = vmax.f32 %v1669_v38, 0.0  ;;  %v2410_v63 = vmax.f32 %v2090_v41, 0.0 }
 0x1fc   :  { %v5189_v10 = vpack.c.bf16 %v2307_v46, %v2306_v34  ;;  %4111 = vmatpush3.bf16.msra.mxu1 %v5118_v25  ;;  %v3931_v34 = vpop.f32.mrb[40].mxu1  ;;  %v5225_v53 = vpack.c.bf16 %v2409_v4, %v2408_v58 }
 0x1fd   :  { %v5198_v20 = vpack.c.bf16 %v2305_v8, %v2304_v7  ;;  %v3827_v30 = vpop.f32.mrb[132].mxu0  ;;  %v5221_v7 = vpack.c.bf16 %v2411_v0, %v2410_v63  ;;  %v2106_v8 = vadd.f32 %v5078_v16, %v3931_v34 }
 0x1fe   :  { %v1690_v25 = vadd.f32 %v5078_v16, %v3827_v30  ;;  %v1681_v24 = vpop.f32.mrb[133].mxu0  ;;  %v2097_v30 = vpop.f32.mrb[41].mxu1 }
 0x1ff   :  { %v1682_v5 = vadd.f32 %v5078_v16, %v1681_v24  ;;  %v3828_v2 = vpop.f32.mrb[134].mxu0  ;;  %2723 = vmatmul.mubr.f32.vlgmr.msra.gmra.mrb[66].mxu1 %v2438_v32  ;;  %v2098_v61 = vadd.f32 %v5078_v16, %v2097_v30  ;;  %v2414_v6 = vmax.f32 %v2106_v8, 0.0 }
 0x200   :  { %v1693_v37 = vadd.f32 %v5078_v16, %v3828_v2  ;;  %v1684_v14 = vpop.f32.mrb[135].mxu0  ;;  %2792 = vmatprep.mubr.f32.mxu1 %v2441_v23  ;;  %v2310_v49 = vmax.f32 %v1690_v25, 0.0  ;;  %v3932_v25 = vpop.f32.mrb[42].mxu1 }
 0x201   :  { %v1685_v11 = vadd.f32 %v5078_v16, %v1684_v14  ;;  %v2308_v55 = vmax.f32 %v1682_v5, 0.0  ;;  %v2109_v33 = vadd.f32 %v5078_v16, %v3932_v25  ;;  %v2100_v5 = vpop.f32.mrb[43].mxu1  ;;  %v2412_v12 = vmax.f32 %v2098_v61, 0.0 }
 0x202   :  { %v2311_v28 = vmax.f32 %v1693_v37, 0.0  ;;  %v2101_v37 = vadd.f32 %v5078_v16, %v2100_v5  ;;  %v3935_v48 = vpop.f32.mrb[44].mxu1 }
 0x203   :  { %v2309_v27 = vmax.f32 %v1685_v11, 0.0  ;;  %v2415_v41 = vmax.f32 %v2109_v33, 0.0  ;;  %v2122_v21 = vadd.f32 %v5078_v16, %v3935_v48  ;;  %v2113_v0 = vpop.f32.mrb[45].mxu1 }
 0x204   :  { %v5216_v39 = vpack.c.bf16 %v2311_v28, %v2310_v49  ;;  %v2413_v43 = vmax.f32 %v2101_v37, 0.0  ;;  %v2114_v4 = vadd.f32 %v5078_v16, %v2113_v0  ;;  %v3936_v34 = vpop.f32.mrb[46].mxu1 }
 0x205   :  { %v5218_v1 = vpack.c.bf16 %v2309_v27, %v2308_v55  ;;  %v3831_v38 = vpop.f32.mrb[136].mxu0  ;;  %v5237_v63 = vpack.c.bf16 %v2415_v41, %v2414_v6  ;;  %v2418_v8 = vmax.f32 %v2122_v21, 0.0 }
 0x206   :  { %v1706_v46 = vadd.f32 %v5078_v16, %v3831_v38  ;;  %v1697_v44 = vpop.f32.mrb[137].mxu0  ;;  %v5241_v27 = vpack.c.bf16 %v2413_v43, %v2412_v12  ;;  %v2416_v30 = vmax.f32 %v2114_v4, 0.0 }
 0x207   :  { %v1698_v9 = vadd.f32 %v5078_v16, %v1697_v44  ;;  %v3832_v32 = vpop.f32.mrb[138].mxu0 }
 0x208   :  { %v1709_v15 = vadd.f32 %v5078_v16, %v3832_v32  ;;  %v1700_v18 = vpop.f32.mrb[139].mxu0  ;;  %v2314_v24 = vmax.f32 %v1706_v46, 0.0  ;;  %v2116_v32 = vpop.f32.mrb[47].mxu1 }
 0x209   :  { %v1701_v23 = vadd.f32 %v5078_v16, %v1700_v18  ;;  %v2312_v2 = vmax.f32 %v1698_v9, 0.0  ;;  %v2125_v9 = vadd.f32 %v5078_v16, %v3936_v34  ;;  %v3939_v33 = vpop.f32.mrb[48].mxu1 }
 0x20a   :  { %v2315_v26 = vmax.f32 %v1709_v15, 0.0  ;;  %v2138_v12 = vadd.f32 %v5078_v16, %v3939_v33 }
 0x20b   :  { %v2313_v36 = vmax.f32 %v1701_v23, 0.0  ;;  %v2117_v23 = vadd.f32 %v5078_v16, %v2116_v32  ;;  %v2419_v25 = vmax.f32 %v2125_v9, 0.0 }
 0x20c   :  { %v5232_v14 = vpack.c.bf16 %v2315_v26, %v2314_v24 }
 0x20d   :  { %v5234_v60 = vpack.c.bf16 %v2313_v36, %v2312_v2  ;;  %v3835_v11 = vpop.f32.mrb[140].mxu0  ;;  %v2417_v6 = vmax.f32 %v2117_v23, 0.0  ;;  %v5253_v36 = vpack.c.bf16 %v2419_v25, %v2418_v8 }
 0x20e   :  { %v1722_v49 = vadd.f32 %v5078_v16, %v3835_v11  ;;  %v1713_v28 = vpop.f32.mrb[141].mxu0 }
 0x20f   :  { %v1714_v31 = vadd.f32 %v5078_v16, %v1713_v28  ;;  %v3836_v55 = vpop.f32.mrb[142].mxu0  ;;  %v5257_v11 = vpack.c.bf16 %v2417_v6, %v2416_v30 }
 0x210   :  { %v1725_v58 = vadd.f32 %v5078_v16, %v3836_v55  ;;  %v1716_v56 = vpop.f32.mrb[143].mxu0  ;;  %v2318_v46 = vmax.f32 %v1722_v49, 0.0  ;;  %v2129_v49 = vpop.f32.mrb[49].mxu1 }
 0x211   :  { %v1717_v38 = vadd.f32 %v5078_v16, %v1716_v56  ;;  %v2316_v15 = vmax.f32 %v1714_v31, 0.0  ;;  %v2130_v21 = vadd.f32 %v5078_v16, %v2129_v49  ;;  %v3940_v31 = vpop.f32.mrb[50].mxu1  ;;  %v2422_v56 = vmax.f32 %v2138_v12, 0.0 }
 0x212   :  { %v2319_v44 = vmax.f32 %v1725_v58, 0.0  ;;  %v2141_v0 = vadd.f32 %v5078_v16, %v3940_v31 }
 0x213   :  { %v2317_v18 = vmax.f32 %v1717_v38, 0.0  ;;  %v2132_v38 = vpop.f32.mrb[51].mxu1 }
 0x214   :  { %v5248_v61 = vpack.c.bf16 %v2319_v44, %v2318_v46  ;;  %v2420_v46 = vmax.f32 %v2130_v21, 0.0  ;;  %v2133_v44 = vadd.f32 %v5078_v16, %v2132_v38  ;;  %v2423_v9 = vmax.f32 %v2141_v0, 0.0 }
 0x215   :  { %v5250_v24 = vpack.c.bf16 %v2317_v18, %v2316_v15  ;;  %v3839_v26 = vpop.f32.mrb[144].mxu0 }
 0x216   :  { %v1738_v5 = vadd.f32 %v5078_v16, %v3839_v26  ;;  %v1729_v2 = vpop.f32.mrb[145].mxu0  ;;  %v2421_v18 = vmax.f32 %v2133_v44, 0.0  ;;  %v5265_v25 = vpack.c.bf16 %v2423_v9, %v2422_v56 }
 0x217   :  { %v1730_v37 = vadd.f32 %v5078_v16, %v1729_v2  ;;  %v3840_v41 = vpop.f32.mrb[146].mxu0 }
 0x218   :  { %v1741_v43 = vadd.f32 %v5078_v16, %v3840_v41  ;;  %v1732_v48 = vpop.f32.mrb[147].mxu0  ;;  %v2322_v55 = vmax.f32 %v1738_v5, 0.0  ;;  %v5268_v33 = vpack.c.bf16 %v2421_v18, %v2420_v46  ;;  %v3943_v5 = vpop.f32.mrb[52].mxu1 }
 0x219   :  { %v1733_v28 = vadd.f32 %v5078_v16, %v1732_v48  ;;  %v2320_v4 = vmax.f32 %v1730_v37, 0.0  ;;  %v2154_v37 = vadd.f32 %v5078_v16, %v3943_v5  ;;  %v2145_v41 = vpop.f32.mrb[53].mxu1 }
 0x21a   :  { %v2323_v58 = vmax.f32 %v1741_v43, 0.0  ;;  %v2146_v48 = vadd.f32 %v5078_v16, %v2145_v41  ;;  %v3944_v49 = vpop.f32.mrb[54].mxu1 }
 0x21b   :  { %v2321_v34 = vmax.f32 %v1733_v28, 0.0  ;;  %v2426_v31 = vmax.f32 %v2154_v37, 0.0 }
 0x21c   :  { %v4116_v8 = vpack.c.bf16 %v2323_v58, %v2322_v55  ;;  %v2157_v55 = vadd.f32 %v5078_v16, %v3944_v49  ;;  %v2148_v58 = vpop.f32.mrb[55].mxu1  ;;  %v2424_v38 = vmax.f32 %v2146_v48, 0.0 }
 0x21d   :  { %v4112_v32 = vpack.c.bf16 %v2321_v34, %v2320_v4  ;;  %v3843_v15 = vpop.f32.mrb[148].mxu0  ;;  %v3947_v9 = vpop.f32.mrb[56].mxu1 }
 0x21e   :  { %v1754_v30 = vadd.f32 %v5078_v16, %v3843_v15  ;;  %v1745_v23 = vpop.f32.mrb[149].mxu0  ;;  %v2427_v34 = vmax.f32 %v2157_v55, 0.0 }
 0x21f   :  { %v1746_v26 = vadd.f32 %v5078_v16, %v1745_v23  ;;  %v3844_v6 = vpop.f32.mrb[150].mxu0  ;;  %4113 = vmatprep.subr.bf16.mxu1 %v4112_v32 }
 0x220   :  { %v1757_v2 = vadd.f32 %v5078_v16, %v3844_v6  ;;  %v1748_v12 = vpop.f32.mrb[151].mxu0  ;;  %4115 = vmatpush3.bf16.msra.mxu1 %v5198_v20  ;;  %v2326_v28 = vmax.f32 %v1754_v30, 0.0  ;;  %v2149_v20 = vadd.f32 %v5078_v16, %v2148_v58  ;;  %v5279_v18 = vpack.c.bf16 %v2427_v34, %v2426_v31 }
 0x221   :  { %v1749_v43 = vadd.f32 %v5078_v16, %v1748_v12  ;;  %4117 = vmatprep.subr.bf16.mxu1 %v4116_v8  ;;  %v2324_v56 = vmax.f32 %v1746_v26, 0.0  ;;  %v2170_v30 = vadd.f32 %v5078_v16, %v3947_v9 }
 0x222   :  { %v2327_v21 = vmax.f32 %v1757_v2, 0.0  ;;  %v2425_v8 = vmax.f32 %v2149_v20, 0.0  ;;  %v2161_v2 = vpop.f32.mrb[57].mxu1 }
 0x223   :  { %v2325_v0 = vmax.f32 %v1749_v43, 0.0  ;;  %v2162_v37 = vadd.f32 %v5078_v16, %v2161_v2  ;;  %v3948_v41 = vpop.f32.mrb[58].mxu1  ;;  %v2430_v49 = vmax.f32 %v2170_v30, 0.0 }
 0x224   :  { %v4124_v4 = vpack.c.bf16 %v2327_v21, %v2326_v28  ;;  %4119 = vmatpush3.bf16.msra.mxu1 %v5189_v10  ;;  %v5283_v6 = vpack.c.bf16 %v2425_v8, %v2424_v38  ;;  %v2173_v28 = vadd.f32 %v5078_v16, %v3948_v41  ;;  %v2164_v21 = vpop.f32.mrb[59].mxu1 }
 0x225   :  { %v4120_v46 = vpack.c.bf16 %v2325_v0, %v2324_v56  ;;  %v3847_v44 = vpop.f32.mrb[152].mxu0  ;;  %v2428_v58 = vmax.f32 %v2162_v37, 0.0  ;;  %v2165_v56 = vadd.f32 %v5078_v16, %v2164_v21  ;;  %v3412_v34 = vpop.f32.mrb[60].mxu1 }
 0x226   :  { %v1770_v32 = vadd.f32 %v5078_v16, %v3847_v44  ;;  %v1761_v15 = vpop.f32.mrb[153].mxu0 }
 0x227   :  { %v1762_v23 = vadd.f32 %v5078_v16, %v1761_v15  ;;  %v3848_v26 = vpop.f32.mrb[154].mxu0  ;;  %4121 = vmatprep.subr.bf16.mxu1 %v4120_v46 }
 0x228   :  { %v1773_v10 = vadd.f32 %v5078_v16, %v3848_v26  ;;  %v1764_v5 = vpop.f32.mrb[155].mxu0  ;;  %4123 = vmatpush3.bf16.msra.mxu1 %v5218_v1  ;;  %v2330_v43 = vmax.f32 %v1770_v32, 0.0  ;;  %v2431_v1 = vmax.f32 %v2173_v28, 0.0 }
 0x229   :  { %v1765_v12 = vadd.f32 %v5078_v16, %v1764_v5  ;;  %4125 = vmatprep.subr.bf16.mxu1 %v4124_v4  ;;  %v2328_v31 = vmax.f32 %v1762_v23, 0.0  ;;  %v2429_v4 = vmax.f32 %v2165_v56, 0.0 }
 0x22a   :  { %v2331_v48 = vmax.f32 %v1773_v10, 0.0  ;;  %v5293_v8 = vpack.c.bf16 %v2431_v1, %v2430_v49 }
 0x22b   :  { %v2329_v55 = vmax.f32 %v1765_v12, 0.0  ;;  %v5296_v15 = vpack.c.bf16 %v2429_v4, %v2428_v58 }
 0x22c   :  { %v4132_v0 = vpack.c.bf16 %v2331_v48, %v2330_v43  ;;  %4127 = vmatpush3.bf16.msra.mxu1 %v5216_v39  ;;  %v3413_v39 = vpop.f32.mrb[61].mxu1 }
 0x22d   :  { %v4128_v38 = vpack.c.bf16 %v2329_v55, %v2328_v31  ;;  %v3851_v20 = vpop.f32.mrb[156].mxu0  ;;  %v5301_v10 = vadd.f32 %v3413_v39, %v3412_v34 }
 0x22e   :  { %v1786_v46 = vadd.f32 %v5078_v16, %v3851_v20  ;;  %v1777_v44 = vpop.f32.mrb[157].mxu0  ;;  %v2440_v20 = vld [vmem:[%s5482_s1 + $0x40] sm:$0xff] }
 0x22f   :  { %v1778_v9 = vadd.f32 %v5078_v16, %v1777_v44  ;;  %v3852_v32 = vpop.f32.mrb[158].mxu0  ;;  %4129 = vmatprep.subr.bf16.mxu1 %v4128_v38 }
 0x230   :  { %v1789_v30 = vadd.f32 %v5078_v16, %v3852_v32  ;;  %v1780_v23 = vpop.f32.mrb[159].mxu0  ;;  %4131 = vmatpush3.bf16.msra.mxu1 %v5234_v60  ;;  %v2334_v5 = vmax.f32 %v1786_v46, 0.0 }
 0x231   :  { %v1781_v26 = vadd.f32 %v5078_v16, %v1780_v23  ;;  %4133 = vmatprep.subr.bf16.mxu1 %v4132_v0  ;;  %v2332_v12 = vmax.f32 %v1778_v9, 0.0 }
 0x232   :  { %v2335_v2 = vmax.f32 %v1789_v30, 0.0 }
 0x233   :  { %v2333_v37 = vmax.f32 %v1781_v26, 0.0 }
 0x234   :  { %v4140_v41 = vpack.c.bf16 %v2335_v2, %v2334_v5  ;;  %4135 = vmatpush3.bf16.msra.mxu1 %v5232_v14 }
 0x235   :  { %v4136_v43 = vpack.c.bf16 %v2333_v37, %v2332_v12  ;;  %v3855_v48 = vpop.f32.mrb[160].mxu0 }
 0x236   :  { %v1802_v49 = vadd.f32 %v5078_v16, %v3855_v48  ;;  %v1793_v28 = vpop.f32.mrb[161].mxu0 }
 0x237   :  { %v1794_v60 = vadd.f32 %v5078_v16, %v1793_v28  ;;  %v3856_v21 = vpop.f32.mrb[162].mxu0  ;;  %4137 = vmatprep.subr.bf16.mxu1 %v4136_v43 }
 0x238   :  { %v1805_v31 = vadd.f32 %v5078_v16, %v3856_v21  ;;  %v1796_v55 = vpop.f32.mrb[163].mxu0  ;;  %4139 = vmatpush3.bf16.msra.mxu1 %v5250_v24  ;;  %v2338_v56 = vmax.f32 %v1802_v49, 0.0  ;;  %v2443_v24 = vld [vmem:[%s5482_s1 + $0x58] sm:$0xff] }
 0x239   :  { %v1797_v58 = vadd.f32 %v5078_v16, %v1796_v55  ;;  %4141 = vmatprep.subr.bf16.mxu1 %v4140_v41  ;;  %v2336_v14 = vmax.f32 %v1794_v60, 0.0 }
 0x23a   :  { %v2339_v0 = vmax.f32 %v1805_v31, 0.0 }
 0x23b   :  { %v2337_v1 = vmax.f32 %v1797_v58, 0.0 }
 0x23c   :  { %v5309_v38 = vpack.c.bf16 %v2339_v0, %v2338_v56  ;;  %4143 = vmatpush3.bf16.msra.mxu1 %v5248_v61 }
 0x23d   :  { %v5315_v4 = vpack.c.bf16 %v2337_v1, %v2336_v14  ;;  %v3859_v34 = vpop.f32.mrb[164].mxu0 }
 0x23e   :  { %v1818_v46 = vadd.f32 %v5078_v16, %v3859_v34  ;;  %v1809_v44 = vpop.f32.mrb[165].mxu0 }
 0x23f   :  { %v1810_v9 = vadd.f32 %v5078_v16, %v1809_v44  ;;  %v3860_v32 = vpop.f32.mrb[166].mxu0  ;;  %2793 = vmatmul.mubr.f32.vlgmr.msra.gmra.mrb[68].mxu1 %v2440_v20 }
 0x240   :  { %v1821_v61 = vadd.f32 %v5078_v16, %v3860_v32  ;;  %v1812_v30 = vpop.f32.mrb[167].mxu0  ;;  %2862 = vmatprep.mubr.f32.mxu1 %v2443_v24  ;;  %v2342_v39 = vmax.f32 %v1818_v46, 0.0 }
 0x241   :  { %v1813_v23 = vadd.f32 %v5078_v16, %v1812_v30  ;;  %v2340_v5 = vmax.f32 %v1810_v9, 0.0 }
 0x242   :  { %v2343_v26 = vmax.f32 %v1821_v61, 0.0 }
 0x243   :  { %v2341_v2 = vmax.f32 %v1813_v23, 0.0 }
 0x244   :  { %v5324_v12 = vpack.c.bf16 %v2343_v26, %v2342_v39 }
 0x245   :  { %v5326_v37 = vpack.c.bf16 %v2341_v2, %v2340_v5  ;;  %v3863_v41 = vpop.f32.mrb[168].mxu0 }
 0x246   :  { %v1834_v43 = vadd.f32 %v5078_v16, %v3863_v41  ;;  %v1825_v48 = vpop.f32.mrb[169].mxu0 }
 0x247   :  { %v1826_v49 = vadd.f32 %v5078_v16, %v1825_v48  ;;  %v3864_v28 = vpop.f32.mrb[170].mxu0 }
 0x248   :  { %v1837_v60 = vadd.f32 %v5078_v16, %v3864_v28  ;;  %v1828_v21 = vpop.f32.mrb[171].mxu0  ;;  %v2346_v55 = vmax.f32 %v1834_v43, 0.0 }
 0x249   :  { %v1829_v31 = vadd.f32 %v5078_v16, %v1828_v21  ;;  %v2344_v56 = vmax.f32 %v1826_v49, 0.0 }
 0x24a   :  { %v2347_v58 = vmax.f32 %v1837_v60, 0.0 }
 0x24b   :  { %v2345_v0 = vmax.f32 %v1829_v31, 0.0 }
 0x24c   :  { %v5332_v14 = vpack.c.bf16 %v2347_v58, %v2346_v55  ;;  %v5352_v58 = vld [vmem:[%s5483_s3] ss:$0 sm:$0xff] }
 0x24d   :  { %v5334_v1 = vpack.c.bf16 %v2345_v0, %v2344_v56  ;;  %v3867_v20 = vpop.f32.mrb[172].mxu0 }
 0x24e   :  { %v1850_v34 = vadd.f32 %v5078_v16, %v3867_v20  ;;  %v1841_v24 = vpop.f32.mrb[173].mxu0 }
 0x24f   :  { %v1842_v46 = vadd.f32 %v5078_v16, %v1841_v24  ;;  %v3868_v44 = vpop.f32.mrb[174].mxu0 }
 0x250   :  { %v1853_v9 = vadd.f32 %v5078_v16, %v3868_v44  ;;  %v1844_v32 = vpop.f32.mrb[175].mxu0  ;;  %v2350_v30 = vmax.f32 %v1850_v34, 0.0 }
 0x251   :  { %v1845_v61 = vadd.f32 %v5078_v16, %v1844_v32  ;;  %v2348_v26 = vmax.f32 %v1842_v46, 0.0 }
 0x252   :  { %v2351_v23 = vmax.f32 %v1853_v9, 0.0  ;;  %v3447_v39 = vpop.f32.mrb[62].mxu1 }
 0x253   :  { %v2349_v5 = vmax.f32 %v1845_v61, 0.0  ;;  %v3448_v2 = vpop.f32.mrb[63].mxu1 }
 0x254   :  { %v5340_v41 = vpack.c.bf16 %v2351_v23, %v2350_v30  ;;  %v3449_v43 = vadd.f32 %v3448_v2, %v3447_v39 }
 0x255   :  { %v5342_v48 = vpack.c.bf16 %v2349_v5, %v2348_v26  ;;  %v3871_v49 = vpop.f32.mrb[176].mxu0 }
 0x256   :  { %v1866_v28 = vadd.f32 %v5078_v16, %v3871_v49  ;;  %v1857_v60 = vpop.f32.mrb[177].mxu0  ;;  %v5346_v21 = vadd.f32 %v3449_v43, %v5301_v10 }
 0x257   :  { %v1858_v31 = vadd.f32 %v5078_v16, %v1857_v60  ;;  %v3872_v55 = vpop.f32.mrb[178].mxu0 }
 0x258   :  { %v1869_v56 = vadd.f32 %v5352_v58, %v3872_v55  ;;  %v1860_v0 = vpop.f32.mrb[179].mxu0  ;;  %v2354_v34 = vmax.f32 %v1866_v28, 0.0 }
 0x259   :  { %v1861_v20 = vadd.f32 %v5352_v58, %v1860_v0  ;;  %v2352_v46 = vmax.f32 %v1858_v31, 0.0 }
 0x25a   :  { %v2355_v24 = vmax.f32 %v1869_v56, 0.0 }
 0x25b   :  { %v2353_v44 = vmax.f32 %v1861_v20, 0.0 }
 0x25c   :  { %v4148_v9 = vpack.c.bf16 %v2355_v24, %v2354_v34 }
 0x25d   :  { %v4144_v10 = vpack.c.bf16 %v2353_v44, %v2352_v46  ;;  %v3875_v32 = vpop.f32.mrb[180].mxu0 }
 0x25e   :  { %v1882_v16 = vadd.f32 %v5352_v58, %v3875_v32  ;;  %v1873_v61 = vpop.f32.mrb[181].mxu0 }
 0x25f   :  { %v1874_v30 = vadd.f32 %v5352_v58, %v1873_v61  ;;  %v3876_v23 = vpop.f32.mrb[182].mxu0  ;;  %4145 = vmatprep.subr.bf16.mxu1 %v4144_v10 }
 0x260   :  { %v1885_v39 = vadd.f32 %v5352_v58, %v3876_v23  ;;  %v1876_v26 = vpop.f32.mrb[183].mxu0  ;;  %4147 = vmatpush3.bf16.msra.mxu1 %v5315_v4  ;;  %v2358_v2 = vmax.f32 %v1882_v16, 0.0 }
 0x261   :  { %v1877_v5 = vadd.f32 %v5352_v58, %v1876_v26  ;;  %4149 = vmatprep.subr.bf16.mxu1 %v4148_v9  ;;  %v2356_v49 = vmax.f32 %v1874_v30, 0.0 }
 0x262   :  { %v2359_v43 = vmax.f32 %v1885_v39, 0.0 }
 0x263   :  { %v2357_v28 = vmax.f32 %v1877_v5, 0.0 }
 0x264   :  { %v4156_v60 = vpack.c.bf16 %v2359_v43, %v2358_v2  ;;  %4151 = vmatpush3.bf16.msra.mxu1 %v5309_v38 }
 0x265   :  { %v4152_v31 = vpack.c.bf16 %v2357_v28, %v2356_v49  ;;  %v3879_v55 = vpop.f32.mrb[184].mxu0 }
 0x266   :  { %v1898_v56 = vadd.f32 %v5352_v58, %v3879_v55  ;;  %v1889_v0 = vpop.f32.mrb[185].mxu0 }
 0x267   :  { %v1890_v20 = vadd.f32 %v5352_v58, %v1889_v0  ;;  %v3880_v34 = vpop.f32.mrb[186].mxu0  ;;  %4153 = vmatprep.subr.bf16.mxu1 %v4152_v31 }
 0x268   :  { %v1901_v4 = vadd.f32 %v5352_v58, %v3880_v34  ;;  %v1892_v24 = vpop.f32.mrb[187].mxu0  ;;  %4155 = vmatpush3.bf16.msra.mxu1 %v5326_v37  ;;  %v2362_v44 = vmax.f32 %v1898_v56, 0.0 }
 0x269   :  { %v1893_v46 = vadd.f32 %v5352_v58, %v1892_v24  ;;  %4157 = vmatprep.subr.bf16.mxu1 %v4156_v60  ;;  %v2360_v38 = vmax.f32 %v1890_v20, 0.0 }
 0x26a   :  { %v2363_v9 = vmax.f32 %v1901_v4, 0.0 }
 0x26b   :  { %v2361_v10 = vmax.f32 %v1893_v46, 0.0 }
 0x26c   :  { %v4164_v32 = vpack.c.bf16 %v2363_v9, %v2362_v44  ;;  %4159 = vmatpush3.bf16.msra.mxu1 %v5324_v12 }
 0x26d   :  { %v4160_v16 = vpack.c.bf16 %v2361_v10, %v2360_v38  ;;  %v3883_v61 = vpop.f32.mrb[188].mxu0  ;;  %v2442_v10 = vld [vmem:[%s5482_s1 + $0x50] sm:$0xff] }
 0x26e   :  { %v1914_v30 = vadd.f32 %v5352_v58, %v3883_v61  ;;  %v1905_v23 = vpop.f32.mrb[189].mxu0  ;;  %v3022_v61 = vld [vmem:[%s5484_s4 + $0x70] sm:$0xff] }
 0x26f   :  { %v1906_v39 = vadd.f32 %v5352_v58, %v1905_v23  ;;  %v3884_v26 = vpop.f32.mrb[190].mxu0  ;;  %4161 = vmatprep.subr.bf16.mxu1 %v4160_v16 }
 0x270   :  { %v1917_v37 = vadd.f32 %v5352_v58, %v3884_v26  ;;  %v1908_v5 = vpop.f32.mrb[191].mxu0  ;;  %4163 = vmatpush3.bf16.msra.mxu1 %v5334_v1  ;;  %v2366_v43 = vmax.f32 %v1914_v30, 0.0  ;;  %v3023_v30 = vld [vmem:[%s5484_s4 + $0x78] sm:$0xff] }
 0x271   :  { %v1909_v2 = vadd.f32 %v5352_v58, %v1908_v5  ;;  %4165 = vmatprep.subr.bf16.mxu1 %v4164_v32  ;;  %v2364_v12 = vmax.f32 %v1906_v39, 0.0  ;;  %v4262_v39 = vpack.c.bf16 %v3023_v30, %v3022_v61  ;;  %v4423_v5 = vmov 0.0  }
 0x272   :  { %v2367_v49 = vmax.f32 %v1917_v37, 0.0 }
 0x273   :  { %v2365_v28 = vmax.f32 %v1909_v2, 0.0 }
 0x274   :  { %v4172_v60 = vpack.c.bf16 %v2367_v49, %v2366_v43  ;;  %4167 = vmatpush3.bf16.msra.mxu1 %v5332_v14 }
 0x275   :  { %v4168_v31 = vpack.c.bf16 %v2365_v28, %v2364_v12  ;;  %v3887_v55 = vpop.f32.mrb[192].mxu0 }
 0x276   :  { %v1930_v56 = vadd.f32 %v5352_v58, %v3887_v55  ;;  %v1921_v0 = vpop.f32.mrb[193].mxu0 }
 0x277   :  { %v1922_v20 = vadd.f32 %v5352_v58, %v1921_v0  ;;  %v3888_v34 = vpop.f32.mrb[194].mxu0  ;;  %4169 = vmatprep.subr.bf16.mxu1 %v4168_v31 }
 0x278   :  { %v2370_v1 = vmax.f32 %v1930_v56, 0.0  ;;  %v1933_v4 = vadd.f32 %v5352_v58, %v3888_v34  ;;  %v1924_v24 = vpop.f32.mrb[195].mxu0  ;;  %4171 = vmatpush3.bf16.msra.mxu1 %v5342_v48  ;;  %v2445_v48 = vld [vmem:[%s5482_s1 + $0x68] sm:$0xff] }
 0x279   :  { %v1925_v46 = vadd.f32 %v5352_v58, %v1924_v24  ;;  %4173 = vmatprep.subr.bf16.mxu1 %v4172_v60  ;;  %v2368_v14 = vmax.f32 %v1922_v20, 0.0 }
 0x27a   :  { %v2371_v44 = vmax.f32 %v1933_v4, 0.0 }
 0x27b   :  { %v2369_v9 = vmax.f32 %v1925_v46, 0.0 }
 0x27c   :  { %v4182_v38 = vpack.c.bf16 %v2371_v44, %v2370_v1  ;;  %4175 = vmatpush3.bf16.msra.mxu1 %v5340_v41  ;;  %v3243_v1 = vld [vmem:[%s5485_s5] ss:$0 sm:$0xff] }
 0x27d   :  { %v4178_v32 = vpack.c.bf16 %v2369_v9, %v2368_v14  ;;  %4177 = vmatprep.subr.bf16.mxu1 %v5132_v52 }
 0x27f   :  { %2863 = vmatmul.mubr.f32.vlgmr.msra.gmra.mrb[70].mxu1 %v2442_v10 }
 0x280   :  { %4179 = vmatpush3.bf16.msra.mxu1 %v4178_v32  ;;  %2932 = vmatprep.mubr.f32.mxu1 %v2445_v48 }
 0x281   :  { %4181 = vmatprep.subr.bf16.mxu1 %v5129_v13 }
 0x284   :  { %4183 = vmatpush3.bf16.msra.mxu1 %v4182_v38 }
 0x285   :  { %4185 = vmatprep.subr.bf16.mxu1 %v5145_v59 }
 0x288   :  { %4187 = vmatpush3.bf16.msra.mxu1 %v5084_v62  ;;  %v2447_v62 = vld [vmem:[%s5482_s1 + $0x78] sm:$0xff] }
 0x289   :  { %4189 = vmatprep.subr.bf16.mxu1 %v5142_v19 }
 0x28c   :  { %4191 = vmatpush3.bf16.msra.mxu1 %v5081_v51  ;;  %v2444_v51 = vld [vmem:[%s5482_s1 + $0x60] sm:$0xff] }
 0x28d   :  { %4193 = vmatprep.subr.bf16.mxu1 %v5159_v57  ;;  %v3009_v57 = vld [vmem:[%s5484_s4 + $0x8] sm:$0xff] }
 0x290   :  { %4195 = vmatpush3.bf16.msra.mxu1 %v5100_v50 }
 0x291   :  { %4197 = vmatprep.subr.bf16.mxu1 %v5156_v54  ;;  %v3008_v54 = vld [vmem:[%s5484_s4] sm:$0xff] }
 0x292   :  { %v3482_v52 = vpop.f32.mrb[64].mxu1 }
 0x293   :  { %v3483_v41 = vpop.f32.mrb[65].mxu1 }
 0x294   :  { %4199 = vmatpush3.bf16.msra.mxu1 %v5097_v22  ;;  %v3484_v13 = vadd.f32 %v3483_v41, %v3482_v52  ;;  %v2446_v22 = vld [vmem:[%s5482_s1 + $0x70] sm:$0xff] }
 0x295   :  { %4201 = vmatprep.subr.bf16.mxu1 %v5173_v35  ;;  %v4421_v35 = vmov 0.0|0.0  }
 0x296   :  { %v2655_v59 = vadd.f32 %v3484_v13, %v5346_v21  ;;  %v3021_v21 = vld [vmem:[%s5484_s4 + $0x68] sm:$0xff] }
 0x298   :  { %4203 = vmatpush3.bf16.msra.mxu1 %v5116_v17 }
 0x299   :  { %4205 = vmatprep.subr.bf16.mxu1 %v5170_v29  ;;  %v3010_v29 = vld [vmem:[%s5484_s4 + $0x10] sm:$0xff] }
 0x29c   :  { %4207 = vmatpush3.bf16.msra.mxu1 %v5113_v45 }
 0x29d   :  { %4209 = vmatprep.subr.bf16.mxu1 %v5257_v11  ;;  %v3016_v11 = vld [vmem:[%s5484_s4 + $0x40] sm:$0xff] }
 0x29f   :  { %2933 = vmatmul.mubr.f32.vlgmr.msra.gmra.mrb[72].mxu1 %v2444_v51 }
 0x2a0   :  { %4211 = vmatpush3.bf16.msra.mxu1 %v5187_v3  ;;  %3002 = vmatprep.mubr.f32.mxu1 %v2447_v62  ;;  %v3011_v3 = vld [vmem:[%s5484_s4 + $0x18] sm:$0xff] }
 0x2a1   :  { %4213 = vmatprep.subr.bf16.mxu1 %v5253_v36 }
 0x2a4   :  { %4215 = vmatpush3.bf16.msra.mxu1 %v5184_v47  ;;  %v4241_v47 = vpack.c.bf16 %v3009_v57, %v3008_v54 }
 0x2a5   :  { %4217 = vmatprep.subr.bf16.mxu1 %v5268_v33 }
 0x2a8   :  { %4219 = vmatpush3.bf16.msra.mxu1 %v5211_v42  ;;  %v3012_v42 = vld [vmem:[%s5484_s4 + $0x20] sm:$0xff] }
 0x2a9   :  { %4221 = vmatprep.subr.bf16.mxu1 %v5265_v25  ;;  %v3017_v25 = vld [vmem:[%s5484_s4 + $0x48] sm:$0xff] }
 0x2aa   :  { %v4253_v33 = vpack.c.bf16 %v3017_v25, %v3016_v11 }
 0x2ac   :  { %4223 = vmatpush3.bf16.msra.mxu1 %v5207_v40  ;;  %v4244_v40 = vpack.c.bf16 %v3011_v3, %v3010_v29 }
 0x2ad   :  { %4225 = vmatprep.subr.bf16.mxu1 %v5283_v6  ;;  %v3019_v6 = vld [vmem:[%s5484_s4 + $0x58] sm:$0xff] }
 0x2b0   :  { %4227 = vmatpush3.bf16.msra.mxu1 %v5225_v53 }
 0x2b1   :  { %4229 = vmatprep.subr.bf16.mxu1 %v5279_v18  ;;  %v3018_v18 = vld [vmem:[%s5484_s4 + $0x50] sm:$0xff] }
 0x2b4   :  { %4231 = vmatpush3.bf16.msra.mxu1 %v5221_v7  ;;  %v3013_v7 = vld [vmem:[%s5484_s4 + $0x28] sm:$0xff] }
 0x2b5   :  { %4233 = vmatprep.subr.bf16.mxu1 %v5296_v15  ;;  %v4247_v53 = vpack.c.bf16 %v3013_v7, %v3012_v42  ;;  %v3020_v15 = vld [vmem:[%s5484_s4 + $0x60] sm:$0xff] }
 0x2b6   :  { %v4259_v58 = vpack.c.bf16 %v3021_v21, %v3020_v15 }
 0x2b8   :  { %4235 = vmatpush3.bf16.msra.mxu1 %v5241_v27  ;;  %v3015_v27 = vld [vmem:[%s5484_s4 + $0x38] sm:$0xff] }
 0x2b9   :  { %4237 = vmatprep.subr.bf16.mxu1 %v5293_v8  ;;  %v4256_v8 = vpack.c.bf16 %v3019_v6, %v3018_v18 }
 0x2bc   :  { %4239 = vmatpush3.bf16.msra.mxu1 %v5237_v63  ;;  %v3014_v63 = vld [vmem:[%s5484_s4 + $0x30] sm:$0xff] }
 0x2bd   :  { %4240 = vmatprep.subr.bf16.mxu1 %v4421_v35  ;;  %v4250_v36 = vpack.c.bf16 %v3015_v27, %v3014_v63 }
 0x2bf   :  { %3003 = vmatmul.mubr.f32.vlgmr.msra.gmra.mrb[74].mxu1 %v2446_v22 }
 0x2c0   :  { %4242 = vmatpush3.bf16.msra.mxu1 %v4241_v47  ;;  %3981 = vmatprep.mubr.msk.f32.mxu1 %vm4422_vm0, %v4423_v5 }
 0x2c1   :  { %4243 = vmatprep.subr.bf16.mxu1 %v4421_v35 }
 0x2c4   :  { %4245 = vmatpush3.bf16.msra.mxu1 %v4244_v40 }
 0x2c5   :  { %4246 = vmatprep.subr.bf16.mxu1 %v4421_v35 }
 0x2c8   :  { %4248 = vmatpush3.bf16.msra.mxu1 %v4247_v53 }
 0x2c9   :  { %4249 = vmatprep.subr.bf16.mxu1 %v4421_v35 }
 0x2cc   :  { %4251 = vmatpush3.bf16.msra.mxu1 %v4250_v36 }
 0x2cd   :  { %4252 = vmatprep.subr.bf16.mxu1 %v4421_v35 }
 0x2d0   :  { %4254 = vmatpush3.bf16.msra.mxu1 %v4253_v33 }
 0x2d1   :  { %4255 = vmatprep.subr.bf16.mxu1 %v4421_v35 }
 0x2d2   :  { %v3517_v50 = vpop.f32.mrb[66].mxu1 }
 0x2d3   :  { %v3518_v45 = vpop.f32.mrb[67].mxu1 }
 0x2d4   :  { %v3519_v17 = vadd.f32 %v3518_v45, %v3517_v50  ;;  %4257 = vmatpush3.bf16.msra.mxu1 %v4256_v8 }
 0x2d5   :  { %4258 = vmatprep.subr.bf16.mxu1 %v4421_v35 }
 0x2d6   :  { %v2725_v19 = vadd.f32 %v3519_v17, %v2655_v59 }
 0x2d8   :  { %4260 = vmatpush3.bf16.msra.mxu1 %v4259_v58 }
 0x2d9   :  { %4261 = vmatprep.subr.bf16.mxu1 %v4421_v35 }
 0x2dc   :  { %4263 = vmatpush3.bf16.msra.mxu1 %v4262_v39 }
 0x312   :  { %v3552_v16 = vpop.f32.mrb[68].mxu1 }
 0x313   :  { %v3553_v23 = vpop.f32.mrb[69].mxu1 }
 0x314   :  { %v3554_v26 = vadd.f32 %v3553_v23, %v3552_v16 }
 0x316   :  { %v2795_v37 = vadd.f32 %v3554_v26, %v2725_v19 }
 0x352   :  { %v3587_v2 = vpop.f32.mrb[70].mxu1 }
 0x353   :  { %v3588_v43 = vpop.f32.mrb[71].mxu1 }
 0x354   :  { %v3589_v49 = vadd.f32 %v3588_v43, %v3587_v2 }
 0x356   :  { %v2865_v12 = vadd.f32 %v3589_v49, %v2795_v37 }
 0x372   :  { %v3622_v28 = vpop.f32.mrb[72].mxu1 }
 0x373   :  { %v3623_v60 = vpop.f32.mrb[73].mxu1 }
 0x374   :  { %v3624_v31 = vadd.f32 %v3623_v60, %v3622_v28 }
 0x376   :  { %v2935_v55 = vadd.f32 %v3624_v31, %v2865_v12 }
 0x392   :  { %v3657_v56 = vpop.f32.mrb[74].mxu1 }
 0x393   :  { %v3658_v0 = vpop.f32.mrb[75].mxu1 }
 0x394   :  { %v3659_v20 = vadd.f32 %v3658_v0, %v3657_v56 }
 0x396   :  { %v3005_v34 = vadd.f32 %v3659_v20, %v2935_v55 }
 0x398   :  { %3982 = vmatmul.mubr.f32.vlgmr.msra.gmra.mrb[76].mxu1 %v3005_v34 }
 0x46b   :  { %v3097_v4 = vpop.f32.mrb[76].mxu1 }
 0x46c   :  { %v3098_v24 = vadd.f32 %v3243_v1, %v3097_v4  ;;  %v3983_v46 = vpop.f32.mrb[77].mxu1 }
 0x46e   :  { %3101 = vst [vmem:[%s5486_s6] sm:$0xff] %v3098_v24 }

</bundles_post_ra>
